<compile_context>
chip_gen: v7x
topology: tpu7x:2x2x1
jax: 0.10.0
libtpu: 0.0.40
codegen_flags: <defaults>
</compile_context>

<pallas_src>
import math
from functools import partial

import jax
import jax.numpy as jnp
from jax.experimental import pallas as pl
from jax.experimental.pallas import tpu as pltpu


HEAD_SLAB = 128  # lane-dense packed output width for the prediction heads


# ----------------------------------------------------------------------------
# Single fused Pallas kernel: patch-embed -> cross-attn fusion -> FFN -> heads
# ----------------------------------------------------------------------------
def _fused_transt_kernel(x_ref, pos_s_ref, pos_t_ref, mask_ref,
                         wf_ref, bf_ref,
                         wao_ref, bao_ref,
                         wff1_ref, bff1_ref, wff2_ref, bff2_ref,
                         wh1_ref, bh1_ref, wh2_ref, bh2_ref, wh3_ref, bh3_ref,
                         out_ref, *, M_s, D):
    f32 = jnp.float32

    # --- fused backbone + input_proj for BOTH branches in one matmul ---------
    # x_ref is [B*Ns + B*Nt, Cp] (search tokens first, template tokens last)
    src = jnp.dot(x_ref[...], wf_ref[...], preferred_element_type=f32) + bf_ref[...]
    src_s = src[:M_s, :]          # [B*Ns, D]   (static, 8-aligned slices)
    src_t = src[M_s:, :]          # [B*Nt, D]

    # --- de-batched single-head cross attention ------------------------------
    # search tokens are queries; template tokens are keys/values.
    scale = 1.0 / math.sqrt(D)
    q = (src_s + pos_s_ref[...]) * scale          # fold 1/sqrt(D) into Q
    k = src_t + pos_t_ref[...]
    # one 2-D matmul [B*Ns, D] x [B*Nt, D]^T, contraction over D
    s = jax.lax.dot_general(q, k, (((1,), (1,)), ((), ())),
                            preferred_element_type=f32)
    s = s + mask_ref[...]                          # -1e30 on cross-batch pairs
    s = s - jnp.max(s, axis=-1, keepdims=True)
    p = jnp.exp(s)
    p = p * pl.reciprocal(jnp.sum(p, axis=-1, keepdims=True), approx=True)
    attn = jnp.dot(p, src_t, preferred_element_type=f32)   # [B*Ns, D]

    # --- attention output projection + residual ------------------------------
    attn = jnp.dot(attn, wao_ref[...], preferred_element_type=f32) + bao_ref[...]
    x = src_s + attn

    # --- FFN + residual -------------------------------------------------------
    h = jnp.dot(x, wff1_ref[...], preferred_element_type=f32) + bff1_ref[...]
    h = jnp.maximum(h, 0.0)
    h = jnp.dot(h, wff2_ref[...], preferred_element_type=f32) + bff2_ref[...]
    tokens = x + h                                                  # [B*Ns, D]

    # --- prediction heads: cls MLP & bbox MLP packed block-diagonally --------
    #   layer1: [wc1 | wb1]      -> [M, 2D]
    #   layer2: blockdiag(wc2,wb2)
    #   layer3: blockdiag(wc3,wb3) padded to 128 lanes -> one unmasked store
    h1 = jnp.maximum(
        jnp.dot(tokens, wh1_ref[...], preferred_element_type=f32) + bh1_ref[...], 0.0)
    h2 = jnp.maximum(
        jnp.dot(h1, wh2_ref[...], preferred_element_type=f32) + bh2_ref[...], 0.0)
    y = jnp.dot(h2, wh3_ref[...], preferred_element_type=f32) + bh3_ref[...]   # [M, 128]

    # lanes [0, nc1) = class logits; lanes [nc1, nc1+4) = bbox logits (raw;
    # sigmoid is applied in the wrapper on the sliced 4 lanes only).
    out_ref[...] = y.astype(out_ref.dtype)


# ----------------------------------------------------------------------------
# Glue (plain JAX): layout plumbing, positional embedding, parameter setup
# ----------------------------------------------------------------------------
def sine_pos_embed(n_tokens, dim):
    pos = jnp.arange(n_tokens, dtype=jnp.float32)[:, None]
    i = jnp.arange(dim, dtype=jnp.float32)[None, :]
    angle = pos / (10000.0 ** (2.0 * jnp.floor(i / 2.0) / dim))
    return jnp.where(i % 2 == 0, jnp.sin(angle), jnp.cos(angle))   # [N, D]


def patchify(img, patch):
    """NCHW image -> [B*Hp*Wp, C*patch*patch] tokens (strided-conv im2col)."""
    B, C, H, W = img.shape
    Hp, Wp = H // patch, W // patch
    x = img.reshape(B, C, Hp, patch, Wp, patch)
    x = x.transpose(0, 2, 4, 1, 3, 5).reshape(B * Hp * Wp, C * patch * patch)
    return x, (B, Hp, Wp)


def init_params(key, *, in_ch=3, patch=4, num_channels=8, hidden=32,
                ffn=64, num_classes=1):
    def dense(k, fan_in, fan_out):
        kw, kb = jax.random.split(k)
        scale = 1.0 / math.sqrt(fan_in)
        w = jax.random.uniform(kw, (fan_in, fan_out), jnp.float32, -scale, scale)
        b = jax.random.uniform(kb, (fan_out,), jnp.float32, -scale, scale)
        return w, b

    ks = jax.random.split(key, 12)
    p = {}
    p["backbone"] = dense(ks[0], in_ch * patch * patch, num_channels)  # stand-in backbone
    p["input_proj"] = dense(ks[1], num_channels, hidden)               # Conv2d(num_channels, hidden, k=1)
    p["attn_out"] = dense(ks[2], hidden, hidden)
    p["ffn1"] = dense(ks[3], hidden, ffn)
    p["ffn2"] = dense(ks[4], ffn, hidden)
    # class_embed: MLP(hidden, hidden, num_classes+1, 3)
    p["cls1"] = dense(ks[5], hidden, hidden)
    p["cls2"] = dense(ks[6], hidden, hidden)
    p["cls3"] = dense(ks[7], hidden, num_classes + 1)
    # bbox_embed: MLP(hidden, hidden, 4, 3)
    p["box1"] = dense(ks[8], hidden, hidden)
    p["box2"] = dense(ks[9], hidden, hidden)
    p["box3"] = dense(ks[10], hidden, 4)
    return p


def fuse_params(p, *, num_classes=1, out_width=HEAD_SLAB):
    """Exact algebraic folding / packing of the PyTorch parameters."""
    wbb, bbb = p["backbone"]
    wip, bip = p["input_proj"]
    wf = wbb @ wip                       # [Cp, D]
    bf = bbb @ wip + bip                 # [D]

    D = wip.shape[1]
    nc1 = num_classes + 1

    wc1, bc1 = p["cls1"]; wc2, bc2 = p["cls2"]; wc3, bc3 = p["cls3"]
    wb1, bb1 = p["box1"]; wb2, bb2 = p["box2"]; wb3, bb3 = p["box3"]

    wh1 = jnp.concatenate([wc1, wb1], axis=1)                      # [D, 2D]
    bh1 = jnp.concatenate([bc1, bb1])                              # [2D]
    z = jnp.zeros((D, D), jnp.float32)
    wh2 = jnp.concatenate([jnp.concatenate([wc2, z], axis=1),
                           jnp.concatenate([z, wb2], axis=1)], axis=0)   # [2D, 2D]
    bh2 = jnp.concatenate([bc2, bb2])                              # [2D]
    wh3 = jnp.zeros((2 * D, out_width), jnp.float32)
    wh3 = wh3.at[:D, :nc1].set(wc3).at[D:, nc1:nc1 + 4].set(wb3)   # [2D, 128]
    bh3 = jnp.zeros((out_width,), jnp.float32)
    bh3 = bh3.at[:nc1].set(bc3).at[nc1:nc1 + 4].set(bb3)           # [128]

    def row(b):  # biases as [1, N] for clean in-kernel broadcast
        return b.reshape(1, -1)

    return dict(
        wf=wf, bf=row(bf),
        wao=p["attn_out"][0], bao=row(p["attn_out"][1]),
        wff1=p["ffn1"][0], bff1=row(p["ffn1"][1]),
        wff2=p["ffn2"][0], bff2=row(p["ffn2"][1]),
        wh1=wh1, bh1=row(bh1), wh2=wh2, bh2=row(bh2), wh3=wh3, bh3=row(bh3),
    )


def prepare_constants(params, *, batch, search_hw, template_hw,
                      patch=4, num_classes=1):
    """Hoisted, input-independent precompute: fused weights, pos embeddings,
    attention block mask, static shape metadata.  Call ONCE, reuse per call."""
    D = params["input_proj"][0].shape[1]
    nc1 = num_classes + 1
    Hs, Ws = search_hw
    Ht, Wt = template_hw
    Ns = (Hs // patch) * (Ws // patch)
    Nt = (Ht // patch) * (Wt // patch)

    consts = fuse_params(params, num_classes=num_classes)

    # positional embeddings tiled across batch -> [B*N, D]
    consts["pos_s"] = jnp.tile(sine_pos_embed(Ns, D), (batch, 1))
    consts["pos_t"] = jnp.tile(sine_pos_embed(Nt, D), (batch, 1))

    # additive block mask: 0 where query-batch == key-batch, else -1e30
    bq = jnp.repeat(jnp.arange(batch, dtype=jnp.int32), Ns)
    bk = jnp.repeat(jnp.arange(batch, dtype=jnp.int32), Nt)
    consts["mask"] = jnp.where(bq[:, None] == bk[None, :],
                               0.0, -1e30).astype(jnp.float32)

    consts["meta"] = dict(B=batch, Ns=Ns, Nt=Nt, D=D, nc1=nc1, patch=patch)
    return consts


def transt_forward(consts, search, template):
    meta = consts["meta"]
    B, Ns, Nt, D = meta["B"], meta["Ns"], meta["Nt"], meta["D"]
    nc1, patch = meta["nc1"], meta["patch"]
    M = B * Ns

    xs, _ = patchify(search, patch)        # [B*Ns, Cp]
    xt, _ = patchify(template, patch)      # [B*Nt, Cp]
    x_cat = jnp.concatenate([xs, xt], axis=0)   # [B*(Ns+Nt), Cp]

    inputs = (x_cat, consts["pos_s"], consts["pos_t"], consts["mask"],
              consts["wf"], consts["bf"],
              consts["wao"], consts["bao"],
              consts["wff1"], consts["bff1"], consts["wff2"], consts["bff2"],
              consts["wh1"], consts["bh1"], consts["wh2"], consts["bh2"],
              consts["wh3"], consts["bh3"])

    # Everything is tiny (<1 MiB total): one grid step, full-array blocks in VMEM.
    in_specs = [pl.BlockSpec(a.shape, lambda i, nd=a.ndim: (0,) * nd)
                for a in inputs]

    slab = pl.pallas_call(
        partial(_fused_transt_kernel, M_s=M, D=D),
        out_shape=jax.ShapeDtypeStruct((M, HEAD_SLAB), jnp.float32),
        grid=(1,),
        in_specs=in_specs,
        out_specs=pl.BlockSpec((M, HEAD_SLAB), lambda i: (0, 0)),
        compiler_params=pltpu.CompilerParams(
            dimension_semantics=("arbitrary",)),
    )(*inputs)                                       # [B*Ns, 128] lane-dense slab

    pred_logits = slab[:, :nc1].reshape(B, Ns, nc1)
    pred_boxes = jax.nn.sigmoid(slab[:, nc1:nc1 + 4]).reshape(B, Ns, 4)
    return {"pred_logits": pred_logits, "pred_boxes": pred_boxes}


if __name__ == "__main__":
    key = jax.random.PRNGKey(0)
    k_params, k_search, k_template = jax.random.split(key, 3)

    params = init_params(k_params)

    # NCHW inputs, small shapes: search 32x32, template 16x16, 3 channels.
    search = jax.random.normal(k_search, (2, 3, 32, 32), jnp.float32)
    template = jax.random.normal(k_template, (2, 3, 16, 16), jnp.float32)

    # One-time precompute of fused weights / pos embeddings / block mask.
    consts = prepare_constants(params, batch=2,
                               search_hw=(32, 32), template_hw=(16, 16),
                               patch=4, num_classes=1)

    fwd = jax.jit(partial(transt_forward, consts))
    out = fwd(search, template)
    jax.block_until_ready(out)

    assert out["pred_logits"].shape == (2, 64, 2)
    assert out["pred_boxes"].shape == (2, 64, 4)
    assert bool(jnp.all(out["pred_boxes"] >= 0.0)) and bool(jnp.all(out["pred_boxes"] <= 1.0))
    assert bool(jnp.all(jnp.isfinite(out["pred_logits"])))
    print("KERNEL_OK")
</pallas_src>

<mosaic_0001>
module attributes {stable_mosaic.version = 11 : i64} {
  func.func @_fused_transt_kernel(%arg0: i32, %arg1: memref<160x48xf32, #tpu.memory_space<vmem>>, %arg2: memref<128x32xf32, #tpu.memory_space<vmem>>, %arg3: memref<32x32xf32, #tpu.memory_space<vmem>>, %arg4: memref<128x32xf32, #tpu.memory_space<vmem>>, %arg5: memref<48x32xf32, #tpu.memory_space<vmem>>, %arg6: memref<1x32xf32, #tpu.memory_space<vmem>>, %arg7: memref<32x32xf32, #tpu.memory_space<vmem>>, %arg8: memref<1x32xf32, #tpu.memory_space<vmem>>, %arg9: memref<32x64xf32, #tpu.memory_space<vmem>>, %arg10: memref<1x64xf32, #tpu.memory_space<vmem>>, %arg11: memref<64x32xf32, #tpu.memory_space<vmem>>, %arg12: memref<1x32xf32, #tpu.memory_space<vmem>>, %arg13: memref<32x64xf32, #tpu.memory_space<vmem>>, %arg14: memref<1x64xf32, #tpu.memory_space<vmem>>, %arg15: memref<64x64xf32, #tpu.memory_space<vmem>>, %arg16: memref<1x64xf32, #tpu.memory_space<vmem>>, %arg17: memref<64x128xf32, #tpu.memory_space<vmem>>, %arg18: memref<1x128xf32, #tpu.memory_space<vmem>>, %arg19: memref<128x128xf32, #tpu.memory_space<vmem>>) attributes {dimension_semantics = [#tpu.dimension_semantics<arbitrary>], iteration_bounds = array<i64: 1>, scalar_prefetch = 0 : i64, scratch_operands = 0 : i64, tpu.core_type = #tpu.core_type<tc>, window_params = [{pipeline_mode = #tpu.pipeline_mode<synchronous>, transform_indices = @transform_0, window_bounds = array<i64: 160, 48>}, {pipeline_mode = #tpu.pipeline_mode<synchronous>, transform_indices = @transform_1, window_bounds = array<i64: 128, 32>}, {pipeline_mode = #tpu.pipeline_mode<synchronous>, transform_indices = @transform_2, window_bounds = array<i64: 32, 32>}, {pipeline_mode = #tpu.pipeline_mode<synchronous>, transform_indices = @transform_3, window_bounds = array<i64: 128, 32>}, {pipeline_mode = #tpu.pipeline_mode<synchronous>, transform_indices = @transform_4, window_bounds = array<i64: 48, 32>}, {pipeline_mode = #tpu.pipeline_mode<synchronous>, transform_indices = @transform_5, window_bounds = array<i64: 1, 32>}, {pipeline_mode = #tpu.pipeline_mode<synchronous>, transform_indices = @transform_6, window_bounds = array<i64: 32, 32>}, {pipeline_mode = #tpu.pipeline_mode<synchronous>, transform_indices = @transform_7, window_bounds = array<i64: 1, 32>}, {pipeline_mode = #tpu.pipeline_mode<synchronous>, transform_indices = @transform_8, window_bounds = array<i64: 32, 64>}, {pipeline_mode = #tpu.pipeline_mode<synchronous>, transform_indices = @transform_9, window_bounds = array<i64: 1, 64>}, {pipeline_mode = #tpu.pipeline_mode<synchronous>, transform_indices = @transform_10, window_bounds = array<i64: 64, 32>}, {pipeline_mode = #tpu.pipeline_mode<synchronous>, transform_indices = @transform_11, window_bounds = array<i64: 1, 32>}, {pipeline_mode = #tpu.pipeline_mode<synchronous>, transform_indices = @transform_12, window_bounds = array<i64: 32, 64>}, {pipeline_mode = #tpu.pipeline_mode<synchronous>, transform_indices = @transform_13, window_bounds = array<i64: 1, 64>}, {pipeline_mode = #tpu.pipeline_mode<synchronous>, transform_indices = @transform_14, window_bounds = array<i64: 64, 64>}, {pipeline_mode = #tpu.pipeline_mode<synchronous>, transform_indices = @transform_15, window_bounds = array<i64: 1, 64>}, {pipeline_mode = #tpu.pipeline_mode<synchronous>, transform_indices = @transform_16, window_bounds = array<i64: 64, 128>}, {pipeline_mode = #tpu.pipeline_mode<synchronous>, transform_indices = @transform_17, window_bounds = array<i64: 1, 128>}, {pipeline_mode = #tpu.pipeline_mode<synchronous>, transform_indices = @transform_18, window_bounds = array<i64: 128, 128>}]} {
    %c0 = arith.constant 0 : index
    %c0_0 = arith.constant 0 : index
    %0 = vector.load %arg1[%c0, %c0_0] : memref<160x48xf32, #tpu.memory_space<vmem>>, vector<160x48xf32>
    %c0_1 = arith.constant 0 : index
    %c0_2 = arith.constant 0 : index
    %1 = vector.load %arg5[%c0_1, %c0_2] : memref<48x32xf32, #tpu.memory_space<vmem>>, vector<48x32xf32>
    %cst = arith.constant dense<0.000000e+00> : vector<160x32xf32>
    %2 = tpu.matmul %0, %1, %cst {dimension_numbers = #tpu.dot_dimension_numbers<[1], [0], [0], [1], [0, 0, 1, 1], [], []>} : vector<160x48xf32>, vector<48x32xf32>, vector<160x32xf32> -> vector<160x32xf32>
    %c0_3 = arith.constant 0 : index
    %c0_4 = arith.constant 0 : index
    %3 = vector.load %arg6[%c0_3, %c0_4] : memref<1x32xf32, #tpu.memory_space<vmem>>, vector<1x32xf32>
    %4 = vector.broadcast %3 : vector<1x32xf32> to vector<160x32xf32>
    %5 = arith.addf %2, %4 : vector<160x32xf32>
    %6 = vector.extract_strided_slice %5 {offsets = [0, 0], sizes = [128, 32], strides = [1, 1]} : vector<160x32xf32> to vector<128x32xf32>
    %7 = vector.extract_strided_slice %5 {offsets = [128, 0], sizes = [32, 32], strides = [1, 1]} : vector<160x32xf32> to vector<32x32xf32>
    %c0_5 = arith.constant 0 : index
    %c0_6 = arith.constant 0 : index
    %8 = vector.load %arg2[%c0_5, %c0_6] : memref<128x32xf32, #tpu.memory_space<vmem>>, vector<128x32xf32>
    %9 = arith.addf %6, %8 : vector<128x32xf32>
    %cst_7 = arith.constant 0.176776692 : f32
    %10 = vector.broadcast %cst_7 : f32 to vector<128x32xf32>
    %11 = arith.mulf %9, %10 : vector<128x32xf32>
    %c0_8 = arith.constant 0 : index
    %c0_9 = arith.constant 0 : index
    %12 = vector.load %arg3[%c0_8, %c0_9] : memref<32x32xf32, #tpu.memory_space<vmem>>, vector<32x32xf32>
    %13 = arith.addf %7, %12 : vector<32x32xf32>
    %cst_10 = arith.constant dense<0.000000e+00> : vector<128x32xf32>
    %14 = tpu.matmul %11, %13, %cst_10 {dimension_numbers = #tpu.dot_dimension_numbers<[1], [1], [0], [0], [0, 0, 1, 0], [], []>} : vector<128x32xf32>, vector<32x32xf32>, vector<128x32xf32> -> vector<128x32xf32>
    %c0_11 = arith.constant 0 : index
    %c0_12 = arith.constant 0 : index
    %15 = vector.load %arg4[%c0_11, %c0_12] : memref<128x32xf32, #tpu.memory_space<vmem>>, vector<128x32xf32>
    %16 = arith.addf %14, %15 : vector<128x32xf32>
    %cst_13 = arith.constant dense<0xFF800000> : vector<128xf32>
    %17 = vector.multi_reduction <maximumf>, %16, %cst_13 [1] : vector<128x32xf32> to vector<128xf32>
    %18 = vector.shape_cast %17 : vector<128xf32> to vector<128x1xf32>
    %19 = vector.broadcast %18 : vector<128x1xf32> to vector<128x32xf32>
    %20 = arith.subf %16, %19 : vector<128x32xf32>
    %21 = math.exp %20 : vector<128x32xf32>
    %cst_14 = arith.constant dense<0.000000e+00> : vector<128xf32>
    %22 = vector.multi_reduction <add>, %21, %cst_14 [1] : vector<128x32xf32> to vector<128xf32>
    %23 = vector.shape_cast %22 : vector<128xf32> to vector<128x1xf32>
    %24 = tpu.reciprocal %23 {approx = true} : vector<128x1xf32> -> vector<128x1xf32>
    %25 = vector.broadcast %24 : vector<128x1xf32> to vector<128x32xf32>
    %26 = arith.mulf %21, %25 : vector<128x32xf32>
    %cst_15 = arith.constant dense<0.000000e+00> : vector<128x32xf32>
    %27 = tpu.matmul %26, %7, %cst_15 {dimension_numbers = #tpu.dot_dimension_numbers<[1], [0], [0], [1], [0, 0, 1, 1], [], []>} : vector<128x32xf32>, vector<32x32xf32>, vector<128x32xf32> -> vector<128x32xf32>
    %c0_16 = arith.constant 0 : index
    %c0_17 = arith.constant 0 : index
    %28 = vector.load %arg7[%c0_16, %c0_17] : memref<32x32xf32, #tpu.memory_space<vmem>>, vector<32x32xf32>
    %cst_18 = arith.constant dense<0.000000e+00> : vector<128x32xf32>
    %29 = tpu.matmul %27, %28, %cst_18 {dimension_numbers = #tpu.dot_dimension_numbers<[1], [0], [0], [1], [0, 0, 1, 1], [], []>} : vector<128x32xf32>, vector<32x32xf32>, vector<128x32xf32> -> vector<128x32xf32>
    %c0_19 = arith.constant 0 : index
    %c0_20 = arith.constant 0 : index
    %30 = vector.load %arg8[%c0_19, %c0_20] : memref<1x32xf32, #tpu.memory_space<vmem>>, vector<1x32xf32>
    %31 = vector.broadcast %30 : vector<1x32xf32> to vector<128x32xf32>
    %32 = arith.addf %29, %31 : vector<128x32xf32>
    %33 = arith.addf %6, %32 : vector<128x32xf32>
    %c0_21 = arith.constant 0 : index
    %c0_22 = arith.constant 0 : index
    %34 = vector.load %arg9[%c0_21, %c0_22] : memref<32x64xf32, #tpu.memory_space<vmem>>, vector<32x64xf32>
    %cst_23 = arith.constant dense<0.000000e+00> : vector<128x64xf32>
    %35 = tpu.matmul %33, %34, %cst_23 {dimension_numbers = #tpu.dot_dimension_numbers<[1], [0], [0], [1], [0, 0, 1, 1], [], []>} : vector<128x32xf32>, vector<32x64xf32>, vector<128x64xf32> -> vector<128x64xf32>
    %c0_24 = arith.constant 0 : index
    %c0_25 = arith.constant 0 : index
    %36 = vector.load %arg10[%c0_24, %c0_25] : memref<1x64xf32, #tpu.memory_space<vmem>>, vector<1x64xf32>
    %37 = vector.broadcast %36 : vector<1x64xf32> to vector<128x64xf32>
    %38 = arith.addf %35, %37 : vector<128x64xf32>
    %cst_26 = arith.constant 0.000000e+00 : f32
    %39 = vector.broadcast %cst_26 : f32 to vector<128x64xf32>
    %40 = arith.maximumf %38, %39 : vector<128x64xf32>
    %c0_27 = arith.constant 0 : index
    %c0_28 = arith.constant 0 : index
    %41 = vector.load %arg11[%c0_27, %c0_28] : memref<64x32xf32, #tpu.memory_space<vmem>>, vector<64x32xf32>
    %cst_29 = arith.constant dense<0.000000e+00> : vector<128x32xf32>
    %42 = tpu.matmul %40, %41, %cst_29 {dimension_numbers = #tpu.dot_dimension_numbers<[1], [0], [0], [1], [0, 0, 1, 1], [], []>} : vector<128x64xf32>, vector<64x32xf32>, vector<128x32xf32> -> vector<128x32xf32>
    %c0_30 = arith.constant 0 : index
    %c0_31 = arith.constant 0 : index
    %43 = vector.load %arg12[%c0_30, %c0_31] : memref<1x32xf32, #tpu.memory_space<vmem>>, vector<1x32xf32>
    %44 = vector.broadcast %43 : vector<1x32xf32> to vector<128x32xf32>
    %45 = arith.addf %42, %44 : vector<128x32xf32>
    %46 = arith.addf %33, %45 : vector<128x32xf32>
    %c0_32 = arith.constant 0 : index
    %c0_33 = arith.constant 0 : index
    %47 = vector.load %arg13[%c0_32, %c0_33] : memref<32x64xf32, #tpu.memory_space<vmem>>, vector<32x64xf32>
    %cst_34 = arith.constant dense<0.000000e+00> : vector<128x64xf32>
    %48 = tpu.matmul %46, %47, %cst_34 {dimension_numbers = #tpu.dot_dimension_numbers<[1], [0], [0], [1], [0, 0, 1, 1], [], []>} : vector<128x32xf32>, vector<32x64xf32>, vector<128x64xf32> -> vector<128x64xf32>
    %c0_35 = arith.constant 0 : index
    %c0_36 = arith.constant 0 : index
    %49 = vector.load %arg14[%c0_35, %c0_36] : memref<1x64xf32, #tpu.memory_space<vmem>>, vector<1x64xf32>
    %50 = vector.broadcast %49 : vector<1x64xf32> to vector<128x64xf32>
    %51 = arith.addf %48, %50 : vector<128x64xf32>
    %cst_37 = arith.constant 0.000000e+00 : f32
    %52 = vector.broadcast %cst_37 : f32 to vector<128x64xf32>
    %53 = arith.maximumf %51, %52 : vector<128x64xf32>
    %c0_38 = arith.constant 0 : index
    %c0_39 = arith.constant 0 : index
    %54 = vector.load %arg15[%c0_38, %c0_39] : memref<64x64xf32, #tpu.memory_space<vmem>>, vector<64x64xf32>
    %cst_40 = arith.constant dense<0.000000e+00> : vector<128x64xf32>
    %55 = tpu.matmul %53, %54, %cst_40 {dimension_numbers = #tpu.dot_dimension_numbers<[1], [0], [0], [1], [0, 0, 1, 1], [], []>} : vector<128x64xf32>, vector<64x64xf32>, vector<128x64xf32> -> vector<128x64xf32>
    %c0_41 = arith.constant 0 : index
    %c0_42 = arith.constant 0 : index
    %56 = vector.load %arg16[%c0_41, %c0_42] : memref<1x64xf32, #tpu.memory_space<vmem>>, vector<1x64xf32>
    %57 = vector.broadcast %56 : vector<1x64xf32> to vector<128x64xf32>
    %58 = arith.addf %55, %57 : vector<128x64xf32>
    %cst_43 = arith.constant 0.000000e+00 : f32
    %59 = vector.broadcast %cst_43 : f32 to vector<128x64xf32>
    %60 = arith.maximumf %58, %59 : vector<128x64xf32>
    %c0_44 = arith.constant 0 : index
    %c0_45 = arith.constant 0 : index
    %61 = vector.load %arg17[%c0_44, %c0_45] : memref<64x128xf32, #tpu.memory_space<vmem>>, vector<64x128xf32>
    %cst_46 = arith.constant dense<0.000000e+00> : vector<128x128xf32>
    %62 = tpu.matmul %60, %61, %cst_46 {dimension_numbers = #tpu.dot_dimension_numbers<[1], [0], [0], [1], [0, 0, 1, 1], [], []>} : vector<128x64xf32>, vector<64x128xf32>, vector<128x128xf32> -> vector<128x128xf32>
    %c0_47 = arith.constant 0 : index
    %c0_48 = arith.constant 0 : index
    %63 = vector.load %arg18[%c0_47, %c0_48] : memref<1x128xf32, #tpu.memory_space<vmem>>, vector<1x128xf32>
    %64 = vector.broadcast %63 : vector<1x128xf32> to vector<128x128xf32>
    %65 = arith.addf %62, %64 : vector<128x128xf32>
    %c0_49 = arith.constant 0 : index
    %c0_50 = arith.constant 0 : index
    %66 = vector.load %arg19[%c0_49, %c0_50] : memref<128x128xf32, #tpu.memory_space<vmem>>, vector<128x128xf32>
    tpu.vector_store %arg19[%c0_49, %c0_50], %65 {strides = array<i32>} : memref<128x128xf32, #tpu.memory_space<vmem>>, vector<128x128xf32>,
    return
  }
  func.func @transform_0(%arg0: i32) -> (i32, i32) {
    %c0_i32 = arith.constant 0 : i32
    %c0_i32_0 = arith.constant 0 : i32
    %c0_i32_1 = arith.constant 0 : i32
    return %c0_i32, %c0_i32_0 : i32, i32
  }
  func.func @transform_1(%arg0: i32) -> (i32, i32) {
    %c0_i32 = arith.constant 0 : i32
    %c0_i32_0 = arith.constant 0 : i32
    %c0_i32_1 = arith.constant 0 : i32
    return %c0_i32, %c0_i32_0 : i32, i32
  }
  func.func @transform_2(%arg0: i32) -> (i32, i32) {
    %c0_i32 = arith.constant 0 : i32
    %c0_i32_0 = arith.constant 0 : i32
    %c0_i32_1 = arith.constant 0 : i32
    return %c0_i32, %c0_i32_0 : i32, i32
  }
  func.func @transform_3(%arg0: i32) -> (i32, i32) {
    %c0_i32 = arith.constant 0 : i32
    %c0_i32_0 = arith.constant 0 : i32
    %c0_i32_1 = arith.constant 0 : i32
    return %c0_i32, %c0_i32_0 : i32, i32
  }
  func.func @transform_4(%arg0: i32) -> (i32, i32) {
    %c0_i32 = arith.constant 0 : i32
    %c0_i32_0 = arith.constant 0 : i32
    %c0_i32_1 = arith.constant 0 : i32
    return %c0_i32, %c0_i32_0 : i32, i32
  }
  func.func @transform_5(%arg0: i32) -> (i32, i32) {
    %c0_i32 = arith.constant 0 : i32
    %c0_i32_0 = arith.constant 0 : i32
    %c0_i32_1 = arith.constant 0 : i32
    return %c0_i32, %c0_i32_0 : i32, i32
  }
  func.func @transform_6(%arg0: i32) -> (i32, i32) {
    %c0_i32 = arith.constant 0 : i32
    %c0_i32_0 = arith.constant 0 : i32
    %c0_i32_1 = arith.constant 0 : i32
    return %c0_i32, %c0_i32_0 : i32, i32
  }
  func.func @transform_7(%arg0: i32) -> (i32, i32) {
    %c0_i32 = arith.constant 0 : i32
    %c0_i32_0 = arith.constant 0 : i32
    %c0_i32_1 = arith.constant 0 : i32
    return %c0_i32, %c0_i32_0 : i32, i32
  }
  func.func @transform_8(%arg0: i32) -> (i32, i32) {
    %c0_i32 = arith.constant 0 : i32
    %c0_i32_0 = arith.constant 0 : i32
    %c0_i32_1 = arith.constant 0 : i32
    return %c0_i32, %c0_i32_0 : i32, i32
  }
  func.func @transform_9(%arg0: i32) -> (i32, i32) {
    %c0_i32 = arith.constant 0 : i32
    %c0_i32_0 = arith.constant 0 : i32
    %c0_i32_1 = arith.constant 0 : i32
    return %c0_i32, %c0_i32_0 : i32, i32
  }
  func.func @transform_10(%arg0: i32) -> (i32, i32) {
    %c0_i32 = arith.constant 0 : i32
    %c0_i32_0 = arith.constant 0 : i32
    %c0_i32_1 = arith.constant 0 : i32
    return %c0_i32, %c0_i32_0 : i32, i32
  }
  func.func @transform_11(%arg0: i32) -> (i32, i32) {
    %c0_i32 = arith.constant 0 : i32
    %c0_i32_0 = arith.constant 0 : i32
    %c0_i32_1 = arith.constant 0 : i32
    return %c0_i32, %c0_i32_0 : i32, i32
  }
  func.func @transform_12(%arg0: i32) -> (i32, i32) {
    %c0_i32 = arith.constant 0 : i32
    %c0_i32_0 = arith.constant 0 : i32
    %c0_i32_1 = arith.constant 0 : i32
    return %c0_i32, %c0_i32_0 : i32, i32
  }
  func.func @transform_13(%arg0: i32) -> (i32, i32) {
    %c0_i32 = arith.constant 0 : i32
    %c0_i32_0 = arith.constant 0 : i32
    %c0_i32_1 = arith.constant 0 : i32
    return %c0_i32, %c0_i32_0 : i32, i32
  }
  func.func @transform_14(%arg0: i32) -> (i32, i32) {
    %c0_i32 = arith.constant 0 : i32
    %c0_i32_0 = arith.constant 0 : i32
    %c0_i32_1 = arith.constant 0 : i32
    return %c0_i32, %c0_i32_0 : i32, i32
  }
  func.func @transform_15(%arg0: i32) -> (i32, i32) {
    %c0_i32 = arith.constant 0 : i32
    %c0_i32_0 = arith.constant 0 : i32
    %c0_i32_1 = arith.constant 0 : i32
    return %c0_i32, %c0_i32_0 : i32, i32
  }
  func.func @transform_16(%arg0: i32) -> (i32, i32) {
    %c0_i32 = arith.constant 0 : i32
    %c0_i32_0 = arith.constant 0 : i32
    %c0_i32_1 = arith.constant 0 : i32
    return %c0_i32, %c0_i32_0 : i32, i32
  }
  func.func @transform_17(%arg0: i32) -> (i32, i32) {
    %c0_i32 = arith.constant 0 : i32
    %c0_i32_0 = arith.constant 0 : i32
    %c0_i32_1 = arith.constant 0 : i32
    return %c0_i32, %c0_i32_0 : i32, i32
  }
  func.func @transform_18(%arg0: i32) -> (i32, i32) {
    %c0_i32 = arith.constant 0 : i32
    %c0_i32_0 = arith.constant 0 : i32
    %c0_i32_1 = arith.constant 0 : i32
    return %c0_i32, %c0_i32_0 : i32, i32
  }
}

</mosaic_0001>

<bundles_post_ra>
// kernel: transt_forward.1
= control target key start
LH: loop header
LB: loop body
LE: loop exit
PB: predicated region body
PF: predicated region fallthrough
CT: control target
= control target key end

     0   :  { %vm92_vm0 = vcmask 392192   ;;  %vm390_vm1 = vcmask 261120   ;;  %vm1420_vm3 = vcmask 523264   ;;  %s4114_s4 = inlined_call_operand.vmem [shape: f32[48,32], index: 4, kind: input, shape index: {}]   ;;  %s4115_s0 = inlined_call_operand.vmem [shape: f32[160,48], index: 0, kind: input, shape index: {}]   ;;  %s4116_s5 = inlined_call_operand.vmem [shape: f32[1,32], index: 5, kind: input, shape index: {}]   ;;  %s4117_s1 = inlined_call_operand.vmem [shape: f32[128,32], index: 1, kind: input, shape index: {}]   ;;  %s4118_s2 = inlined_call_operand.vmem [shape: f32[32,32], index: 2, kind: input, shape index: {}]   ;;  %s4119_s3 = inlined_call_operand.vmem [shape: f32[128,32], index: 3, kind: input, shape index: {}]   ;;  %s4120_s6 = inlined_call_operand.vmem [shape: f32[32,32], index: 6, kind: input, shape index: {}]   ;;  %s4121_s8 = inlined_call_operand.vmem [shape: f32[32,64], index: 8, kind: input, shape index: {}]   ;;  %s4122_s10 = inlined_call_operand.vmem [shape: f32[64,32], index: 10, kind: input, shape index: {}]   ;;  %s4123_s7 = inlined_call_operand.vmem [shape: f32[1,32], index: 7, kind: input, shape index: {}]   ;;  %s4124_s12 = inlined_call_operand.vmem [shape: f32[32,64], index: 12, kind: input, shape index: {}]   ;;  %s4125_s9 = inlined_call_operand.vmem [shape: f32[1,64], index: 9, kind: input, shape index: {}]   ;;  %s4126_s14 = inlined_call_operand.vmem [shape: f32[64,64], index: 14, kind: input, shape index: {}]   ;;  %s4127_s11 = inlined_call_operand.vmem [shape: f32[1,32], index: 11, kind: input, shape index: {}]   ;;  %s4128_s16 = inlined_call_operand.vmem [shape: f32[64,128], index: 16, kind: input, shape index: {}]   ;;  %s4129_s13 = inlined_call_operand.vmem [shape: f32[1,64], index: 13, kind: input, shape index: {}]   ;;  %s4130_s15 = inlined_call_operand.vmem [shape: f32[1,64], index: 15, kind: input, shape index: {}]   ;;  %s4131_s17 = inlined_call_operand.vmem [shape: f32[1,128], index: 17, kind: input, shape index: {}]   ;;  %s4132_s18 = inlined_call_operand.vmem [shape: f32[128,128], index: 18, kind: output, shape index: {}]  }
   0x1   :  { %4135 = sst [smem:[#allocation2_spill]] %s4114_s4  ;;  %v318_v32 = vld [vmem:[%s4117_s1] sm:$0xff]  ;;  %v324_v42 = vld [vmem:[%s4117_s1 + $0x30] sm:$0xff]  ;;  %v367_v56 = vld [vmem:[%s4118_s2 + $0x8] sm:$0xff] }
   0x2   :  { %4136 = sst [smem:[#allocation3_spill]] %s4115_s0  ;;  %s4138_s29 = sld [smem:[#allocation2_spill]]  ;;  %v366_v59 = vld [vmem:[%s4118_s2] sm:$0xff]  ;;  %vm3396_vm2 = vmpackc.low %vm390_vm1, %vm390_vm1 }
   0x3   :  { %4137 = sst [smem:[#allocation4_spill]] %s4116_s5  ;;  %s4139_s27 = sld [smem:[#allocation3_spill]] }
   0x4   :  { %s4140_s25 = sld [smem:[#allocation4_spill]] }
   0x8   :  { %v79_v0 = vld [vmem:[%s4138_s29] sm:$0xff]  ;;  %v80_v1 = vld [vmem:[%s4138_s29 + $0x8] sm:$0xff]  ;;  %v81_v2 = vld [vmem:[%s4138_s29 + $0x10] sm:$0xff] }
   0x9   :  { %v2981_v3 = vpack.c.bf16 %v80_v1, %v79_v0  ;;  %v82_v4 = vld [vmem:[%s4138_s29 + $0x18] sm:$0xff]  ;;  %v83_v6 = vld [vmem:[%s4138_s29 + $0x20] sm:$0xff]  ;;  %v84_v7 = vld [vmem:[%s4138_s29 + $0x28] sm:$0xff] }
   0xa   :  { %v2985_v5 = vpack.c.bf16 %v82_v4, %v81_v2  ;;  %v59_v8 = vld [vmem:[%s4139_s27] sm:$0xff]  ;;  %v2989_v9 = vpack.c.bf16 %v84_v7, %v83_v6  ;;  %v60_v10 = vld [vmem:[%s4139_s27 + $0x8] sm:$0xff]  ;;  %v61_v11 = vld [vmem:[%s4139_s27 + $0x10] sm:$0xff] }
   0xb   :  { %2982 = vmatprep.subr.bf16.mxu0 %v2981_v3  ;;  %2671 = vmatprep.mubr.msk.f32.mxu0 %vm92_vm0, %v59_v8  ;;  %v62_v12 = vld [vmem:[%s4139_s27 + $0x18] sm:$0xff]  ;;  %v63_v13 = vld [vmem:[%s4139_s27 + $0x20] sm:$0xff]  ;;  %v64_v14 = vld [vmem:[%s4139_s27 + $0x28] sm:$0xff] }
   0xc   :  { %2984 = vmatpush3.bf16.msra.mxu0 %v2981_v3  ;;  %v65_v15 = vld [vmem:[%s4139_s27 + $0x30] sm:$0xff]  ;;  %v66_v16 = vld [vmem:[%s4139_s27 + $0x38] sm:$0xff]  ;;  %v67_v17 = vld [vmem:[%s4139_s27 + $0x40] sm:$0xff] }
   0xd   :  { %2986 = vmatprep.subr.bf16.mxu0 %v2985_v5  ;;  %v68_v18 = vld [vmem:[%s4139_s27 + $0x48] sm:$0xff]  ;;  %v69_v19 = vld [vmem:[%s4139_s27 + $0x50] sm:$0xff]  ;;  %v70_v20 = vld [vmem:[%s4139_s27 + $0x58] sm:$0xff] }
   0xe   :  { %v71_v21 = vld [vmem:[%s4139_s27 + $0x60] sm:$0xff]  ;;  %v72_v22 = vld [vmem:[%s4139_s27 + $0x68] sm:$0xff]  ;;  %v73_v23 = vld [vmem:[%s4139_s27 + $0x70] sm:$0xff] }
   0xf   :  { %v74_v24 = vld [vmem:[%s4139_s27 + $0x78] sm:$0xff]  ;;  %v75_v25 = vld [vmem:[%s4139_s27 + $0x80] sm:$0xff]  ;;  %v76_v26 = vld [vmem:[%s4139_s27 + $0x88] sm:$0xff] }
  0x10   :  { %2988 = vmatpush3.bf16.msra.mxu0 %v2985_v5  ;;  %v77_v27 = vld [vmem:[%s4139_s27 + $0x90] sm:$0xff]  ;;  %v78_v28 = vld [vmem:[%s4139_s27 + $0x98] sm:$0xff]  ;;  %v3349_v29 = vld [vmem:[%s4140_s25] ss:$0 sm:$0xff] }
  0x11   :  { %2990 = vmatprep.subr.bf16.mxu0 %v2989_v9  ;;  %v369_v1 = vld [vmem:[%s4118_s2 + $0x18] sm:$0xff]  ;;  %v368_v5 = vld [vmem:[%s4118_s2 + $0x10] sm:$0xff] }
  0x14   :  { %2992 = vmatpush3.bf16.msra.mxu0 %v2989_v9 }
  0x17   :  { %2672 = vmatmul.mubr.msk.f32.vlgmr.msra.gmra.mrb[0].mxu0 %vm92_vm0, %v60_v10 }
  0x18   :  { %2674 = vmatprep.mubr.msk.f32.mxu0 %vm92_vm0, %v61_v11 }
  0x1b   :  { %2675 = vmatmul.mubr.msk.f32.gmra.mrb[2].mxu0 %vm92_vm0, %v62_v12 }
  0x1c   :  { %2677 = vmatprep.mubr.msk.f32.mxu0 %vm92_vm0, %v63_v13  ;;  %v319_v13 = vld [vmem:[%s4117_s1 + $0x8] sm:$0xff] }
  0x1f   :  { %2678 = vmatmul.mubr.msk.f32.gmra.mrb[4].mxu0 %vm92_vm0, %v64_v14 }
  0x20   :  { %2680 = vmatprep.mubr.msk.f32.mxu0 %vm92_vm0, %v65_v15 }
  0x23   :  { %2681 = vmatmul.mubr.msk.f32.gmra.mrb[6].mxu0 %vm92_vm0, %v66_v16  ;;  %v320_v16 = vld [vmem:[%s4117_s1 + $0x10] sm:$0xff] }
  0x24   :  { %2683 = vmatprep.mubr.msk.f32.mxu0 %vm92_vm0, %v67_v17  ;;  %v325_v17 = vld [vmem:[%s4117_s1 + $0x38] sm:$0xff] }
  0x27   :  { %2684 = vmatmul.mubr.msk.f32.gmra.mrb[8].mxu0 %vm92_vm0, %v68_v18 }
  0x28   :  { %2686 = vmatprep.mubr.msk.f32.mxu0 %vm92_vm0, %v69_v19  ;;  %v326_v19 = vld [vmem:[%s4117_s1 + $0x40] sm:$0xff] }
  0x2b   :  { %2687 = vmatmul.mubr.msk.f32.gmra.mrb[10].mxu0 %vm92_vm0, %v70_v20 }
  0x2c   :  { %2689 = vmatprep.mubr.msk.f32.mxu0 %vm92_vm0, %v71_v21 }
  0x2f   :  { %2690 = vmatmul.mubr.msk.f32.gmra.mrb[12].mxu0 %vm92_vm0, %v72_v22  ;;  %v321_v22 = vld [vmem:[%s4117_s1 + $0x18] sm:$0xff] }
  0x30   :  { %2692 = vmatprep.mubr.msk.f32.mxu0 %vm92_vm0, %v73_v23 }
  0x33   :  { %2693 = vmatmul.mubr.msk.f32.gmra.mrb[14].mxu0 %vm92_vm0, %v74_v24 }
  0x34   :  { %2695 = vmatprep.mubr.msk.f32.mxu0 %vm92_vm0, %v75_v25 }
  0x37   :  { %2696 = vmatmul.mubr.msk.f32.gmra.mrb[16].mxu0 %vm92_vm0, %v76_v26 }
  0x38   :  { %2698 = vmatprep.mubr.msk.f32.mxu0 %vm92_vm0, %v77_v27  ;;  %v327_v27 = vld [vmem:[%s4117_s1 + $0x48] sm:$0xff] }
  0x3b   :  { %2699 = vmatmul.mubr.msk.f32.gmra.mrb[18].mxu0 %vm92_vm0, %v78_v28 }
  0xea   :  { %v2673_v30 = vpop.f32.mrb[0].mxu0 }
  0xeb   :  { %v219_v31 = vpop.f32.mrb[1].mxu0  ;;  %v3419_v12 = vadd.f32 %v2673_v30, %v3349_v29 }
  0xec   :  { %v3355_v33 = vadd.f32 %v3349_v29, %v219_v31  ;;  %v322_v31 = vld [vmem:[%s4117_s1 + $0x20] sm:$0xff] }
  0xed   :  { %v335_v20 = vadd.f32 %v319_v13, %v3419_v12 }
  0xee   :  { %v334_v34 = vadd.f32 %v318_v32, %v3355_v33  ;;  %v2676_v35 = vpop.f32.mrb[2].mxu0  ;;  %v328_v32 = vld [vmem:[%s4117_s1 + $0x50] sm:$0xff] }
  0xef   :  { %v229_v36 = vpop.f32.mrb[3].mxu0  ;;  %v3444_v21 = vadd.f32 %v2676_v35, %v3349_v29 }
  0xf0   :  { %v350_v37 = vmul.f32 0.17677669, %v334_v34  ;;  %v3425_v14 = vadd.f32 %v3349_v29, %v229_v36  ;;  %v351_v34 = vmul.f32 0.17677669, %v335_v20 }
  0xf1   :  { %v337_v35 = vadd.f32 %v321_v22, %v3444_v21 }
  0xf2   :  { %v3358_v38 = vpop.f32.mrb[4].mxu0  ;;  %2709 = vmatprep.mubr.msk.f32.mxu0 %vm390_vm1, %v350_v37  ;;  %v336_v23 = vadd.f32 %v320_v16, %v3425_v14  ;;  %v376_v16 = vld [vmem:[%s4119_s3 + $0x10] sm:$0xff] }
  0xf3   :  { %v239_v39 = vpop.f32.mrb[5].mxu0  ;;  %v3478_v36 = vadd.f32 %v3358_v38, %v3349_v29  ;;  %v329_v38 = vld [vmem:[%s4117_s1 + $0x58] sm:$0xff] }
  0xf4   :  { %v3460_v26 = vadd.f32 %v3349_v29, %v239_v39  ;;  %v352_v37 = vmul.f32 0.17677669, %v336_v23  ;;  %v377_v23 = vld [vmem:[%s4119_s3 + $0x18] sm:$0xff] }
  0xf6   :  { %v2682_v40 = vpop.f32.mrb[6].mxu0 }
  0xf7   :  { %v249_v41 = vpop.f32.mrb[7].mxu0  ;;  %v3428_v15 = vadd.f32 %v2682_v40, %v3349_v29 }
  0xf8   :  { %v3365_v43 = vadd.f32 %v3349_v29, %v249_v41 }
  0xf9   :  { %v341_v24 = vadd.f32 %v325_v17, %v3428_v15 }
  0xfa   :  { %v2685_v44 = vpop.f32.mrb[8].mxu0  ;;  %v340_v45 = vadd.f32 %v324_v42, %v3365_v43  ;;  %v323_v42 = vld [vmem:[%s4117_s1 + $0x28] sm:$0xff] }
  0xfb   :  { %v259_v46 = vpop.f32.mrb[9].mxu0  ;;  %v3456_v25 = vadd.f32 %v2685_v44, %v3349_v29  ;;  %v357_v39 = vmul.f32 0.17677669, %v341_v24  ;;  %v338_v44 = vadd.f32 %v322_v31, %v3460_v26  ;;  %v378_v31 = vld [vmem:[%s4119_s3 + $0x20] sm:$0xff] }
  0xfc   :  { %v356_v47 = vmul.f32 0.17677669, %v340_v45  ;;  %v3437_v18 = vadd.f32 %v3349_v29, %v259_v46 }
  0xfd   :  { %v343_v40 = vadd.f32 %v327_v27, %v3456_v25 }
  0xfe   :  { %v3368_v48 = vpop.f32.mrb[10].mxu0  ;;  %2718 = vmatprep.mubr.msk.f32.mxu1 %vm390_vm1, %v356_v47  ;;  %v342_v28 = vadd.f32 %v326_v19, %v3437_v18 }
  0xff   :  { %v269_v49 = vpop.f32.mrb[11].mxu0  ;;  %v3483_v41 = vadd.f32 %v3368_v48, %v3349_v29  ;;  %v330_v48 = vld [vmem:[%s4117_s1 + $0x60] sm:$0xff] }
 0x100   :  { %v3467_v30 = vadd.f32 %v3349_v29, %v269_v49  ;;  %v358_v45 = vmul.f32 0.17677669, %v342_v28  ;;  %v353_v49 = vmul.f32 0.17677669, %v337_v35 }
 0x102   :  { %v3371_v50 = vpop.f32.mrb[12].mxu0  ;;  %v344_v46 = vadd.f32 %v328_v32, %v3467_v30 }
 0x103   :  { %v3373_v51 = vpop.f32.mrb[13].mxu0 }
 0x104   :  { %v3495_v47 = vadd.f32 %v3349_v29, %v3373_v51  ;;  %v3508_v51 = vadd.f32 %v3371_v50, %v3349_v29  ;;  %v332_v50 = vld [vmem:[%s4117_s1 + $0x70] sm:$0xff] }
 0x106   :  { %v2694_v52 = vpop.f32.mrb[14].mxu0 }
 0x107   :  { %v3376_v53 = vadd.f32 %v2694_v52, %v3349_v29  ;;  %v3378_v54 = vpop.f32.mrb[15].mxu0  ;;  %v339_v52 = vadd.f32 %v323_v42, %v3478_v36  ;;  %v379_v42 = vld [vmem:[%s4119_s3 + $0x28] sm:$0xff] }
 0x10a   :  { %v2697_v55 = vpop.f32.mrb[16].mxu0 }
 0x10b   :  { %v305_v57 = vadd.f32 %v2697_v55, %v3349_v29  ;;  %v299_v58 = vpop.f32.mrb[17].mxu0  ;;  %v359_v55 = vmul.f32 0.17677669, %v343_v40  ;;  %v380_v40 = vld [vmem:[%s4119_s3 + $0x30] sm:$0xff] }
 0x10c   :  { %v300_v60 = vadd.f32 %v3349_v29, %v299_v58  ;;  %v360_v58 = vmul.f32 0.17677669, %v344_v46 }
 0x10d   :  { %v371_v61 = vadd.f32 %v367_v56, %v305_v57  ;;  %v345_v56 = vadd.f32 %v329_v38, %v3483_v41 }
 0x10e   :  { %v370_v62 = vadd.f32 %v366_v59, %v300_v60  ;;  %v3388_v63 = vpack.c.bf16 %v305_v57, %v300_v60  ;;  %v2700_v0 = vpop.f32.mrb[18].mxu0  ;;  %v354_v57 = vmul.f32 0.17677669, %v338_v44  ;;  %v331_v59 = vld [vmem:[%s4117_s1 + $0x68] sm:$0xff]  ;;  %v346_v60 = vadd.f32 %v330_v48, %v3495_v47 }
 0x10f   :  { %v315_v2 = vadd.f32 %v2700_v0, %v3349_v29  ;;  %v309_v4 = vpop.f32.mrb[19].mxu0  ;;  %v347_v0 = vadd.f32 %v331_v59, %v3508_v51 }
 0x110   :  { %v2993_v6 = vpack.c.bf16 %v371_v61, %v370_v62  ;;  %v310_v7 = vadd.f32 %v3349_v29, %v309_v4  ;;  %v3517_v61 = vadd.f32 %v3349_v29, %v3378_v54  ;;  %v355_v62 = vmul.f32 0.17677669, %v339_v52  ;;  %v333_v54 = vld [vmem:[%s4117_s1 + $0x78] sm:$0xff] }
 0x111   :  { %v373_v8 = vadd.f32 %v369_v1, %v315_v2  ;;  %v362_v29 = vmul.f32 0.17677669, %v346_v60  ;;  %v349_v3 = vadd.f32 %v333_v54, %v3376_v53 }
 0x112   :  { %2995 = vmatprep.subr.msk.bf16.mxu0 %vm3396_vm2, %v2993_v6  ;;  %3085 = vmatprep.subr.msk.bf16.mxu1 %vm3396_vm2, %v2993_v6  ;;  %v372_v9 = vadd.f32 %v368_v5, %v310_v7  ;;  %v3408_v10 = vpack.c.bf16 %v315_v2, %v310_v7  ;;  %v348_v1 = vadd.f32 %v332_v50, %v3517_v61  ;;  %v363_v2 = vmul.f32 0.17677669, %v347_v0  ;;  %v383_v0 = vld [vmem:[%s4119_s3 + $0x48] sm:$0xff] }
 0x113   :  { %2998 = vmatpush3.bf16.xpose.msk.msra.mxu0 %vm3396_vm2, %v2993_v6  ;;  %3087 = vmatpush3.bf16.xpose.msk.msra.mxu1 %vm3396_vm2, %v2993_v6  ;;  %v365_v5 = vmul.f32 0.17677669, %v349_v3  ;;  %v374_v6 = vld [vmem:[%s4119_s3] sm:$0xff] }
 0x114   :  { %v2999_v11 = vpack.c.bf16 %v373_v8, %v372_v9  ;;  %v364_v4 = vmul.f32 0.17677669, %v348_v1  ;;  %v375_v9 = vld [vmem:[%s4119_s3 + $0x8] sm:$0xff] }
 0x116   :  { %3001 = vmatprep.subr.msk.bf16.mxu0 %vm3396_vm2, %v2999_v11  ;;  %3086 = vmatprep.subr.msk.bf16.mxu1 %vm3396_vm2, %v2999_v11 }
 0x11b   :  { %3004 = vmatpush3.bf16.xpose.msk.msra.mxu0 %vm3396_vm2, %v2999_v11  ;;  %3088 = vmatpush3.bf16.xpose.msk.msra.mxu1 %vm3396_vm2, %v2999_v11 }
 0x11c   :  { %3006 = vmatprep.subr.bf16.mxu1 %v3388_v63 }
 0x122   :  { %2710 = vmatmul.mubr.msk.f32.vlgmr.msra.gmra.mrb[20].mxu0 %vm390_vm1, %v351_v34  ;;  %2719 = vmatmul.mubr.msk.f32.vlgmr.msra.gmra.mrb[0].mxu1 %vm390_vm1, %v357_v39 }
 0x123   :  { %2712 = vmatprep.mubr.msk.f32.mxu0 %vm390_vm1, %v352_v37  ;;  %2721 = vmatprep.mubr.msk.f32.mxu1 %vm390_vm1, %v358_v45 }
 0x124   :  { %3008 = vmatpush3.bf16.msra.mxu1 %v3388_v63  ;;  %v361_v63 = vmul.f32 0.17677669, %v345_v56  ;;  %v381_v56 = vld [vmem:[%s4119_s3 + $0x38] sm:$0xff] }
 0x125   :  { %3010 = vmatprep.subr.bf16.mxu1 %v3408_v10 }
 0x126   :  { %2713 = vmatmul.mubr.msk.f32.gmra.mrb[22].mxu0 %vm390_vm1, %v353_v49  ;;  %2722 = vmatmul.mubr.msk.f32.gmra.mrb[2].mxu1 %vm390_vm1, %v359_v55 }
 0x127   :  { %2715 = vmatprep.mubr.msk.f32.mxu0 %vm390_vm1, %v354_v57  ;;  %2724 = vmatprep.mubr.msk.f32.mxu1 %vm390_vm1, %v360_v58  ;;  %v382_v57 = vld [vmem:[%s4119_s3 + $0x40] sm:$0xff] }
 0x128   :  { %3012 = vmatpush3.bf16.msra.mxu1 %v3408_v10 }
 0x12a   :  { %2716 = vmatmul.mubr.msk.f32.gmra.mrb[24].mxu0 %vm390_vm1, %v355_v62  ;;  %2725 = vmatmul.mubr.msk.f32.gmra.mrb[4].mxu1 %vm390_vm1, %v361_v63 }
 0x12b   :  { %2727 = vmatprep.mubr.msk.f32.mxu1 %vm390_vm1, %v362_v29  ;;  %v384_v29 = vld [vmem:[%s4119_s3 + $0x50] sm:$0xff] }
 0x12e   :  { %2728 = vmatmul.mubr.msk.f32.gmra.mrb[6].mxu1 %vm390_vm1, %v363_v2 }
 0x12f   :  { %2730 = vmatprep.mubr.msk.f32.mxu1 %vm390_vm1, %v364_v4 }
 0x132   :  { %2731 = vmatmul.mubr.msk.f32.gmra.mrb[8].mxu1 %vm390_vm1, %v365_v5  ;;  %v385_v5 = vld [vmem:[%s4119_s3 + $0x58] sm:$0xff] }
 0x1f5   :  { %v2711_v7 = vpop.f32.mrb[20].mxu0  ;;  %v2720_v8 = vpop.f32.mrb[0].mxu1 }
 0x1f6   :  { %v517_v10 = vpop.f32.mrb[21].mxu0  ;;  %v547_v11 = vpop.f32.mrb[1].mxu1  ;;  %v3551_v17 = vadd.f32 %v2711_v7, %v375_v9  ;;  %v3591_v59 = vadd.f32 %v2720_v8, %v381_v56 }
 0x1f7   :  { %v3546_v13 = vadd.f32 %v517_v10, %v374_v6  ;;  %v3577_v46 = vadd.f32 %v547_v11, %v380_v40  ;;  %v386_v6 = vld [vmem:[%s4119_s3 + $0x60] sm:$0xff]  ;;  %v387_v11 = vld [vmem:[%s4119_s3 + $0x68] sm:$0xff] }
 0x1f8   :  { %v599_v39 = vsel %vm390_vm1, %v3551_v17, -inf  ;;  %v617_v3 = vsel %vm390_vm1, %v3591_v59, -inf }
 0x1f9   :  { %v2714_v19 = vpop.f32.mrb[22].mxu0  ;;  %v2723_v20 = vpop.f32.mrb[2].mxu1  ;;  %v596_v22 = vsel %vm390_vm1, %v3546_v13, -inf  ;;  %v614_v63 = vsel %vm390_vm1, %v3577_v46, -inf }
 0x1fa   :  { %v527_v24 = vpop.f32.mrb[23].mxu0  ;;  %v557_v27 = vpop.f32.mrb[3].mxu1  ;;  %597 = vmax.xlane.f32.xlu0 %v596_v22  ;;  %v3563_v32 = vadd.f32 %v2714_v19, %v377_v23  ;;  %v3605_v1 = vadd.f32 %v2723_v20, %v383_v0 }
 0x1fb   :  { %v3558_v28 = vadd.f32 %v527_v24, %v376_v16  ;;  %v3593_v60 = vadd.f32 %v557_v27, %v382_v57  ;;  %v388_v16 = vld [vmem:[%s4119_s3 + $0x70] sm:$0xff]  ;;  %v389_v24 = vld [vmem:[%s4119_s3 + $0x78] sm:$0xff] }
 0x1fc   :  { %v605_v52 = vsel %vm390_vm1, %v3563_v32, -inf  ;;  %v623_v9 = vsel %vm390_vm1, %v3605_v1, -inf }
 0x1fd   :  { %v2717_v34 = vpop.f32.mrb[24].mxu0  ;;  %v2726_v35 = vpop.f32.mrb[4].mxu1  ;;  %v602_v37 = vsel %vm390_vm1, %v3558_v28, -inf  ;;  %v620_v4 = vsel %vm390_vm1, %v3593_v60, -inf }
 0x1fe   :  { %v537_v44 = vpop.f32.mrb[25].mxu0  ;;  %v567_v45 = vpop.f32.mrb[5].mxu1  ;;  %603 = vmax.xlane.f32.xlu1 %v602_v37  ;;  %600 = vmax.xlane.f32.xlu0 %v599_v39  ;;  %v3579_v48 = vadd.f32 %v2717_v34, %v379_v42  ;;  %v3619_v7 = vadd.f32 %v2726_v35, %v385_v5 }
 0x1ff   :  { %v3575_v38 = vadd.f32 %v537_v44, %v378_v31  ;;  %v3607_v2 = vadd.f32 %v567_v45, %v384_v29 }
 0x200   :  { %v611_v62 = vsel %vm390_vm1, %v3579_v48, -inf  ;;  %v629_v22 = vsel %vm390_vm1, %v3619_v7, -inf }
 0x201   :  { %v2729_v49 = vpop.f32.mrb[6].mxu1  ;;  %v608_v55 = vsel %vm390_vm1, %v3575_v38, -inf  ;;  %v626_v10 = vsel %vm390_vm1, %v3607_v2, -inf }
 0x202   :  { %v577_v58 = vpop.f32.mrb[7].mxu1  ;;  %606 = vmax.xlane.f32.xlu1 %v605_v52  ;;  %609 = vmax.xlane.f32.xlu0 %v608_v55  ;;  %v3633_v19 = vadd.f32 %v2729_v49, %v387_v11 }
 0x203   :  { %v3621_v8 = vadd.f32 %v577_v58, %v386_v6 }
 0x204   :  { %v635_v31 = vsel %vm390_vm1, %v3633_v19, -inf }
 0x205   :  { %v2732_v50 = vpop.f32.mrb[8].mxu1  ;;  %v632_v23 = vsel %vm390_vm1, %v3621_v8, -inf }
 0x206   :  { %v587_v54 = vpop.f32.mrb[9].mxu1  ;;  %612 = vmax.xlane.f32.xlu1 %v611_v62  ;;  %615 = vmax.xlane.f32.xlu0 %v614_v63  ;;  %v3644_v27 = vadd.f32 %v2732_v50, %v389_v24 }
 0x207   :  { %v3635_v20 = vadd.f32 %v587_v54, %v388_v16 }
 0x208   :  { %v641_v35 = vsel %vm390_vm1, %v3644_v27, -inf }
 0x209   :  { %v638_v34 = vsel %vm390_vm1, %v3635_v20, -inf }
 0x20a   :  { %618 = vmax.xlane.f32.xlu1 %v617_v3  ;;  %621 = vmax.xlane.f32.xlu0 %v620_v4 }
 0x20e   :  { %624 = vmax.xlane.f32.xlu1 %v623_v9  ;;  %627 = vmax.xlane.f32.xlu0 %v626_v10 }
 0x212   :  { %630 = vmax.xlane.f32.xlu1 %v629_v22  ;;  %633 = vmax.xlane.f32.xlu0 %v632_v23 }
 0x216   :  { %636 = vmax.xlane.f32.xlu1 %v635_v31  ;;  %639 = vmax.xlane.f32.xlu0 %v638_v34 }
 0x21a   :  { %642 = vmax.xlane.f32.xlu1 %v641_v35 }
 0x287   :  { %v598_v37 = vpop.xlane.xlu0 %597 }
 0x288   :  { %v644_v39 = vsub.f32 %v3546_v13, %v598_v37 }
 0x28a   :  { %v660_v40 = vmul.f32 1.442695, %v644_v39 }
 0x28b   :  { %v604_v42 = vpop.xlane.xlu1 %603  ;;  %v601_v44 = vpop.xlane.xlu0 %600 }
 0x28c   :  { %3089 = vpow2.f32 %v660_v40  ;;  %v646_v45 = vsub.f32 %v3558_v28, %v604_v42  ;;  %v645_v49 = vsub.f32 %v3551_v17, %v601_v44 }
 0x28e   :  { %v664_v52 = vmul.f32 1.442695, %v646_v45  ;;  %v662_v55 = vmul.f32 1.442695, %v645_v49 }
 0x28f   :  { %v607_v56 = vpop.xlane.xlu1 %606  ;;  %v610_v57 = vpop.xlane.xlu0 %609 }
 0x290   :  { %3091 = vpow2.f32 %v664_v52  ;;  %v647_v58 = vsub.f32 %v3563_v32, %v607_v56  ;;  %v648_v50 = vsub.f32 %v3575_v38, %v610_v57 }
 0x291   :  { %3093 = vpow2.f32 %v662_v55 }
 0x292   :  { %v666_v62 = vmul.f32 1.442695, %v647_v58  ;;  %v668_v13 = vmul.f32 1.442695, %v648_v50 }
 0x293   :  { %v613_v63 = vpop.xlane.xlu1 %612  ;;  %v616_v0 = vpop.xlane.xlu0 %615 }
 0x294   :  { %3095 = vpow2.f32 %v666_v62  ;;  %v649_v29 = vsub.f32 %v3579_v48, %v613_v63  ;;  %v650_v28 = vsub.f32 %v3577_v46, %v616_v0 }
 0x295   :  { %3097 = vpow2.f32 %v668_v13 }
 0x296   :  { %v3659_v17 = vpop.eup %3089  ;;  %v670_v54 = vmul.f32 1.442695, %v649_v29  ;;  %v672_v3 = vmul.f32 1.442695, %v650_v28 }
 0x297   :  { %v619_v4 = vpop.xlane.xlu1 %618  ;;  %v622_v5 = vpop.xlane.xlu0 %621  ;;  %v692_v32 = vsel %vm390_vm1, %v3659_v17, 0.0 }
 0x298   :  { %3099 = vpow2.f32 %v670_v54  ;;  %v651_v38 = vsub.f32 %v3591_v59, %v619_v4  ;;  %v652_v6 = vsub.f32 %v3593_v60, %v622_v5  ;;  %693 = vadd.xlane.f32.xlu0 %v692_v32 }
 0x299   :  { %3101 = vpow2.f32 %v672_v3 }
 0x29a   :  { %v3665_v48 = vpop.eup %3091  ;;  %v674_v46 = vmul.f32 1.442695, %v651_v38  ;;  %v676_v9 = vmul.f32 1.442695, %v652_v6 }
 0x29b   :  { %v3667_v10 = vpop.eup %3093  ;;  %v625_v11 = vpop.xlane.xlu1 %624  ;;  %v698_v22 = vsel %vm390_vm1, %v3665_v48, 0.0 }
 0x29c   :  { %v628_v16 = vpop.xlane.xlu0 %627  ;;  %3103 = vpow2.f32 %v674_v46  ;;  %v653_v23 = vsub.f32 %v3605_v1, %v625_v11  ;;  %699 = vadd.xlane.f32.xlu0 %v698_v22  ;;  %v695_v60 = vsel %vm390_vm1, %v3667_v10, 0.0 }
 0x29d   :  { %v654_v59 = vsub.f32 %v3607_v2, %v628_v16  ;;  %3105 = vpow2.f32 %v676_v9  ;;  %696 = vadd.xlane.f32.xlu1 %v695_v60  ;;  %v966_v60 = vld [vmem:[%s4120_s6 + $0x8] sm:$0xff] }
 0x29e   :  { %v3675_v24 = vpop.eup %3095  ;;  %v678_v31 = vmul.f32 1.442695, %v653_v23 }
 0x29f   :  { %v680_v34 = vmul.f32 1.442695, %v654_v59  ;;  %v3677_v35 = vpop.eup %3097  ;;  %v631_v37 = vpop.xlane.xlu1 %630  ;;  %v701_v40 = vsel %vm390_vm1, %v3675_v24, 0.0  ;;  %v965_v59 = vld [vmem:[%s4120_s6] sm:$0xff] }
 0x2a0   :  { %v634_v39 = vpop.xlane.xlu0 %633  ;;  %3107 = vpow2.f32 %v678_v31  ;;  %v655_v1 = vsub.f32 %v3619_v7, %v631_v37  ;;  %v704_v42 = vsel %vm390_vm1, %v3677_v35, 0.0  ;;  %v967_v31 = vld [vmem:[%s4120_s6 + $0x10] sm:$0xff]  ;;  %v968_v37 = vld [vmem:[%s4120_s6 + $0x18] sm:$0xff] }
 0x2a1   :  { %v656_v2 = vsub.f32 %v3621_v8, %v634_v39  ;;  %3109 = vpow2.f32 %v680_v34  ;;  %702 = vadd.xlane.f32.xlu1 %v701_v40  ;;  %705 = vadd.xlane.f32.xlu0 %v704_v42  ;;  %v3013_v34 = vpack.c.bf16 %v966_v60, %v965_v59  ;;  %v3017_v39 = vpack.c.bf16 %v968_v37, %v967_v31 }
 0x2a2   :  { %v3685_v44 = vpop.eup %3099  ;;  %v682_v45 = vmul.f32 1.442695, %v655_v1 }
 0x2a3   :  { %v684_v49 = vmul.f32 1.442695, %v656_v2  ;;  %v3687_v52 = vpop.eup %3101  ;;  %v637_v55 = vpop.xlane.xlu1 %636  ;;  %v707_v57 = vsel %vm390_vm1, %v3685_v44, 0.0  ;;  %3014 = vmatprep.subr.bf16.mxu0 %v3013_v34 }
 0x2a4   :  { %v640_v56 = vpop.xlane.xlu0 %639  ;;  %3111 = vpow2.f32 %v682_v45  ;;  %v657_v7 = vsub.f32 %v3633_v19, %v637_v55  ;;  %v710_v58 = vsel %vm390_vm1, %v3687_v52, 0.0  ;;  %3016 = vmatpush3.bf16.msra.mxu0 %v3013_v34 }
 0x2a5   :  { %v658_v8 = vsub.f32 %v3635_v20, %v640_v56  ;;  %3113 = vpow2.f32 %v684_v49  ;;  %708 = vadd.xlane.f32.xlu1 %v707_v57  ;;  %711 = vadd.xlane.f32.xlu0 %v710_v58 }
 0x2a6   :  { %v3695_v50 = vpop.eup %3103  ;;  %v686_v62 = vmul.f32 1.442695, %v657_v7  ;;  %3018 = vmatprep.subr.bf16.mxu0 %v3017_v39 }
 0x2a7   :  { %v688_v13 = vmul.f32 1.442695, %v658_v8  ;;  %v3697_v63 = vpop.eup %3105  ;;  %v643_v0 = vpop.xlane.xlu1 %642  ;;  %v713_v29 = vsel %vm390_vm1, %v3695_v50, 0.0 }
 0x2a8   :  { %3115 = vpow2.f32 %v686_v62  ;;  %v659_v19 = vsub.f32 %v3644_v27, %v643_v0  ;;  %v716_v20 = vsel %vm390_vm1, %v3697_v63, 0.0  ;;  %3020 = vmatpush3.bf16.msra.mxu0 %v3017_v39 }
 0x2a9   :  { %3117 = vpow2.f32 %v688_v13  ;;  %714 = vadd.xlane.f32.xlu1 %v713_v29  ;;  %717 = vadd.xlane.f32.xlu0 %v716_v20 }
 0x2aa   :  { %v3704_v28 = vpop.eup %3107  ;;  %v690_v54 = vmul.f32 1.442695, %v659_v19 }
 0x2ab   :  { %v3706_v3 = vpop.eup %3109  ;;  %v719_v4 = vsel %vm390_vm1, %v3704_v28, 0.0 }
 0x2ac   :  { %3119 = vpow2.f32 %v690_v54  ;;  %v722_v5 = vsel %vm390_vm1, %v3706_v3, 0.0 }
 0x2ad   :  { %720 = vadd.xlane.f32.xlu1 %v719_v4  ;;  %723 = vadd.xlane.f32.xlu0 %v722_v5 }
 0x2ae   :  { %v3712_v27 = vpop.eup %3111 }
 0x2af   :  { %v3714_v32 = vpop.eup %3113  ;;  %v725_v38 = vsel %vm390_vm1, %v3712_v27, 0.0 }
 0x2b0   :  { %v728_v6 = vsel %vm390_vm1, %v3714_v32, 0.0 }
 0x2b1   :  { %726 = vadd.xlane.f32.xlu1 %v725_v38  ;;  %729 = vadd.xlane.f32.xlu0 %v728_v6 }
 0x2b2   :  { %v3720_v46 = vpop.eup %3115 }
 0x2b3   :  { %v3722_v9 = vpop.eup %3117  ;;  %v731_v11 = vsel %vm390_vm1, %v3720_v46, 0.0 }
 0x2b4   :  { %v734_v16 = vsel %vm390_vm1, %v3722_v9, 0.0 }
 0x2b5   :  { %732 = vadd.xlane.f32.xlu1 %v731_v11  ;;  %735 = vadd.xlane.f32.xlu0 %v734_v16 }
 0x2b6   :  { %v3728_v22 = vpop.eup %3119 }
 0x2b7   :  { %v737_v23 = vsel %vm390_vm1, %v3728_v22, 0.0 }
 0x2b9   :  { %738 = vadd.xlane.f32.xlu1 %v737_v23 }
 0x325   :  { %v694_v40 = vpop.xlane.xlu0 %693 }
 0x326   :  { %3121 = vrcp.f32 %v694_v40 }
 0x329   :  { %v700_v1 = vpop.xlane.xlu0 %699 }
 0x32a   :  { %v697_v2 = vpop.xlane.xlu1 %696  ;;  %3123 = vrcp.f32 %v700_v1 }
 0x32b   :  { %3125 = vrcp.f32 %v697_v2 }
 0x32e   :  { %v703_v42 = vpop.xlane.xlu1 %702  ;;  %v706_v45 = vpop.xlane.xlu0 %705 }
 0x32f   :  { %3127 = vrcp.f32 %v703_v42 }
 0x330   :  { %v3122_v49 = vpop.eup %3121  ;;  %3129 = vrcp.f32 %v706_v45 }
 0x331   :  { %v756_v55 = vmul.f32 %v3122_v49, %v3659_v17 }
 0x332   :  { %v709_v56 = vpop.xlane.xlu1 %708  ;;  %v712_v57 = vpop.xlane.xlu0 %711 }
 0x333   :  { %3131 = vrcp.f32 %v709_v56  ;;  %2741 = vmatprep.mubr.msk.f32.mxu1 %vm390_vm1, %v756_v55 }
 0x334   :  { %v3124_v7 = vpop.eup %3123  ;;  %3133 = vrcp.f32 %v712_v57 }
 0x335   :  { %v3126_v8 = vpop.eup %3125  ;;  %v758_v58 = vmul.f32 %v3124_v7, %v3665_v48 }
 0x336   :  { %v757_v62 = vmul.f32 %v3126_v8, %v3667_v10  ;;  %v715_v13 = vpop.xlane.xlu1 %714  ;;  %v718_v0 = vpop.xlane.xlu0 %717 }
 0x337   :  { %3135 = vrcp.f32 %v715_v13 }
 0x338   :  { %3137 = vrcp.f32 %v718_v0  ;;  %2742 = vmatmul.mubr.msk.f32.vlgmr.msra.gmra.mrb[10].mxu1 %vm390_vm1, %v757_v62 }
 0x339   :  { %v3128_v29 = vpop.eup %3127  ;;  %2744 = vmatprep.mubr.msk.f32.mxu1 %vm390_vm1, %v758_v58 }
 0x33a   :  { %v3130_v17 = vpop.eup %3129  ;;  %v721_v19 = vpop.xlane.xlu1 %720  ;;  %v759_v54 = vmul.f32 %v3128_v29, %v3675_v24 }
 0x33b   :  { %v724_v20 = vpop.xlane.xlu0 %723  ;;  %3139 = vrcp.f32 %v721_v19  ;;  %v760_v4 = vmul.f32 %v3130_v17, %v3677_v35 }
 0x33c   :  { %3141 = vrcp.f32 %v724_v20  ;;  %2745 = vmatmul.mubr.msk.f32.gmra.mrb[12].mxu1 %vm390_vm1, %v759_v54  ;;  %v1187_v54 = vld [vmem:[%s4121_s8 + $0x10] sm:$0xff] }
 0x33d   :  { %v3132_v48 = vpop.eup %3131  ;;  %2747 = vmatprep.mubr.msk.f32.mxu1 %vm390_vm1, %v760_v4  ;;  %v1188_v4 = vld [vmem:[%s4121_s8 + $0x18] sm:$0xff] }
 0x33e   :  { %v3134_v10 = vpop.eup %3133  ;;  %v727_v5 = vpop.xlane.xlu1 %726  ;;  %v761_v6 = vmul.f32 %v3132_v48, %v3685_v44  ;;  %v3025_v48 = vpack.c.bf16 %v1188_v4, %v1187_v54 }
 0x33f   :  { %v730_v38 = vpop.xlane.xlu0 %729  ;;  %3143 = vrcp.f32 %v727_v5  ;;  %v762_v11 = vmul.f32 %v3134_v10, %v3687_v52  ;;  %v1405_v10 = vld [vmem:[%s4122_s10] sm:$0xff]  ;;  %v1406_v5 = vld [vmem:[%s4122_s10 + $0x8] sm:$0xff] }
 0x340   :  { %3145 = vrcp.f32 %v730_v38  ;;  %2748 = vmatmul.mubr.msk.f32.gmra.mrb[14].mxu1 %vm390_vm1, %v761_v6  ;;  %v1407_v38 = vld [vmem:[%s4122_s10 + $0x10] sm:$0xff]  ;;  %v3029_v6 = vpack.c.bf16 %v1406_v5, %v1405_v10  ;;  %v2376_v10 = vld [vmem:[%s4125_s9] ss:$0 sm:$0xff] }
 0x341   :  { %v3136_v24 = vpop.eup %3135  ;;  %2750 = vmatprep.mubr.msk.f32.mxu1 %vm390_vm1, %v762_v11  ;;  %v1408_v11 = vld [vmem:[%s4122_s10 + $0x18] sm:$0xff] }
 0x342   :  { %v3138_v35 = vpop.eup %3137  ;;  %v733_v16 = vpop.xlane.xlu1 %732  ;;  %v763_v59 = vmul.f32 %v3136_v24, %v3695_v50  ;;  %v3033_v24 = vpack.c.bf16 %v1408_v11, %v1407_v38  ;;  %3030 = vmatprep.subr.bf16.mxu0 %v3029_v6 }
 0x343   :  { %v736_v23 = vpop.xlane.xlu0 %735  ;;  %3147 = vrcp.f32 %v733_v16  ;;  %v764_v60 = vmul.f32 %v3138_v35, %v3697_v63  ;;  %v1409_v35 = vld [vmem:[%s4122_s10 + $0x20] sm:$0xff]  ;;  %v1410_v16 = vld [vmem:[%s4122_s10 + $0x28] sm:$0xff] }
 0x344   :  { %3149 = vrcp.f32 %v736_v23  ;;  %2751 = vmatmul.mubr.msk.f32.gmra.mrb[16].mxu1 %vm390_vm1, %v763_v59  ;;  %v3037_v23 = vpack.c.bf16 %v1410_v16, %v1409_v35  ;;  %v2359_v59 = vld [vmem:[%s4123_s7] ss:$0 sm:$0xff] }
 0x345   :  { %v3140_v44 = vpop.eup %3139  ;;  %2753 = vmatprep.mubr.msk.f32.mxu1 %vm390_vm1, %v764_v60 }
 0x346   :  { %v3142_v52 = vpop.eup %3141  ;;  %v739_v31 = vpop.xlane.xlu1 %738  ;;  %v765_v34 = vmul.f32 %v3140_v44, %v3704_v28 }
 0x347   :  { %3151 = vrcp.f32 %v739_v31  ;;  %v766_v37 = vmul.f32 %v3142_v52, %v3706_v3 }
 0x348   :  { %2754 = vmatmul.mubr.msk.f32.gmra.mrb[18].mxu1 %vm390_vm1, %v765_v34 }
 0x349   :  { %v3144_v39 = vpop.eup %3143  ;;  %2756 = vmatprep.mubr.msk.f32.mxu1 %vm390_vm1, %v766_v37 }
 0x34a   :  { %v3146_v50 = vpop.eup %3145  ;;  %v767_v63 = vmul.f32 %v3144_v39, %v3712_v27  ;;  %v1185_v27 = vld [vmem:[%s4121_s8] sm:$0xff] }
 0x34b   :  { %v768_v40 = vmul.f32 %v3146_v50, %v3714_v32  ;;  %v1186_v32 = vld [vmem:[%s4121_s8 + $0x8] sm:$0xff] }
 0x34c   :  { %2757 = vmatmul.mubr.msk.f32.gmra.mrb[20].mxu1 %vm390_vm1, %v767_v63 }
 0x34d   :  { %v3148_v1 = vpop.eup %3147  ;;  %2759 = vmatprep.mubr.msk.f32.mxu1 %vm390_vm1, %v768_v40 }
 0x34e   :  { %v3150_v2 = vpop.eup %3149  ;;  %v769_v28 = vmul.f32 %v3148_v1, %v3720_v46  ;;  %v3021_v46 = vpack.c.bf16 %v1186_v32, %v1185_v27 }
 0x34f   :  { %v770_v3 = vmul.f32 %v3150_v2, %v3722_v9 }
 0x350   :  { %2760 = vmatmul.mubr.msk.f32.gmra.mrb[22].mxu1 %vm390_vm1, %v769_v28  ;;  %3022 = vmatprep.subr.bf16.mxu1 %v3021_v46 }
 0x351   :  { %v3152_v42 = vpop.eup %3151  ;;  %2762 = vmatprep.mubr.msk.f32.mxu1 %vm390_vm1, %v770_v3  ;;  %3024 = vmatpush3.bf16.msra.mxu1 %v3021_v46 }
 0x352   :  { %v771_v45 = vmul.f32 %v3152_v42, %v3728_v22  ;;  %3026 = vmatprep.subr.bf16.mxu1 %v3025_v48 }
 0x354   :  { %2763 = vmatmul.mubr.msk.f32.gmra.mrb[24].mxu1 %vm390_vm1, %v771_v45 }
 0x355   :  { %3028 = vmatpush3.bf16.msra.mxu1 %v3025_v48 }
 0x40b   :  { %v2743_v9 = vpop.f32.mrb[10].mxu1 }
 0x40c   :  { %v886_v49 = vpop.f32.mrb[11].mxu1 }
 0x40d   :  { %2773 = vmatprep.mubr.msk.f32.mxu0 %vm390_vm1, %v886_v49 }
 0x40e   :  { %2774 = vmatmul.mubr.msk.f32.vlgmr.msra.gmra.mrb[26].mxu0 %vm390_vm1, %v2743_v9 }
 0x40f   :  { %v2746_v22 = vpop.f32.mrb[12].mxu1  ;;  %3032 = vmatpush3.bf16.msra.mxu0 %v3029_v6 }
 0x410   :  { %v896_v55 = vpop.f32.mrb[13].mxu1  ;;  %3034 = vmatprep.subr.bf16.mxu0 %v3033_v24 }
 0x411   :  { %2776 = vmatprep.mubr.msk.f32.mxu0 %vm390_vm1, %v896_v55 }
 0x412   :  { %2777 = vmatmul.mubr.msk.f32.gmra.mrb[28].mxu0 %vm390_vm1, %v2746_v22 }
 0x413   :  { %v2749_v56 = vpop.f32.mrb[14].mxu1  ;;  %3036 = vmatpush3.bf16.msra.mxu0 %v3033_v24 }
 0x414   :  { %v906_v57 = vpop.f32.mrb[15].mxu1  ;;  %3038 = vmatprep.subr.bf16.mxu0 %v3037_v23 }
 0x415   :  { %2779 = vmatprep.mubr.msk.f32.mxu0 %vm390_vm1, %v906_v57 }
 0x416   :  { %2780 = vmatmul.mubr.msk.f32.gmra.mrb[30].mxu0 %vm390_vm1, %v2749_v56 }
 0x417   :  { %v2752_v7 = vpop.f32.mrb[16].mxu1  ;;  %3040 = vmatpush3.bf16.msra.mxu0 %v3037_v23 }
 0x418   :  { %v916_v8 = vpop.f32.mrb[17].mxu1 }
 0x419   :  { %2782 = vmatprep.mubr.msk.f32.mxu0 %vm390_vm1, %v916_v8 }
 0x41a   :  { %2783 = vmatmul.mubr.msk.f32.gmra.mrb[32].mxu0 %vm390_vm1, %v2752_v7 }
 0x41b   :  { %v2755_v58 = vpop.f32.mrb[18].mxu1 }
 0x41c   :  { %v926_v62 = vpop.f32.mrb[19].mxu1 }
 0x41d   :  { %2785 = vmatprep.mubr.msk.f32.mxu0 %vm390_vm1, %v926_v62 }
 0x41e   :  { %2786 = vmatmul.mubr.msk.f32.gmra.mrb[34].mxu0 %vm390_vm1, %v2755_v58 }
 0x41f   :  { %v2758_v13 = vpop.f32.mrb[20].mxu1 }
 0x420   :  { %v936_v0 = vpop.f32.mrb[21].mxu1 }
 0x421   :  { %2788 = vmatprep.mubr.msk.f32.mxu0 %vm390_vm1, %v936_v0 }
 0x422   :  { %2789 = vmatmul.mubr.msk.f32.gmra.mrb[36].mxu0 %vm390_vm1, %v2758_v13 }
 0x423   :  { %v2761_v29 = vpop.f32.mrb[22].mxu1 }
 0x424   :  { %v946_v17 = vpop.f32.mrb[23].mxu1 }
 0x425   :  { %2791 = vmatprep.mubr.msk.f32.mxu0 %vm390_vm1, %v946_v17 }
 0x426   :  { %2792 = vmatmul.mubr.msk.f32.gmra.mrb[38].mxu0 %vm390_vm1, %v2761_v29 }
 0x427   :  { %v2764_v19 = vpop.f32.mrb[24].mxu1 }
 0x428   :  { %v956_v20 = vpop.f32.mrb[25].mxu1 }
 0x429   :  { %2794 = vmatprep.mubr.msk.f32.mxu0 %vm390_vm1, %v956_v20 }
 0x42a   :  { %2795 = vmatmul.mubr.msk.f32.gmra.mrb[40].mxu0 %vm390_vm1, %v2764_v19 }
 0x4e1   :  { %v2775_v60 = vpop.f32.mrb[26].mxu0 }
 0x4e2   :  { %v1096_v44 = vadd.f32 %v2775_v60, %v2359_v59  ;;  %v1090_v52 = vpop.f32.mrb[27].mxu0 }
 0x4e3   :  { %v1091_v31 = vadd.f32 %v2359_v59, %v1090_v52 }
 0x4e4   :  { %v3829_v39 = vadd.f32 %v1096_v44, %v3419_v12 }
 0x4e5   :  { %v3826_v34 = vadd.f32 %v1091_v31, %v3355_v33  ;;  %v2778_v37 = vpop.f32.mrb[28].mxu0 }
 0x4e6   :  { %v1106_v50 = vadd.f32 %v2778_v37, %v2359_v59  ;;  %v1100_v63 = vpop.f32.mrb[29].mxu0 }
 0x4e7   :  { %v1101_v40 = vadd.f32 %v2359_v59, %v1100_v63  ;;  %2805 = vmatprep.mubr.msk.f32.mxu1 %vm390_vm1, %v3826_v34 }
 0x4e8   :  { %2806 = vmatmul.mubr.msk.f32.vlgmr.msra.gmra.mrb[26].mxu1 %vm390_vm1, %v3829_v39  ;;  %v3839_v33 = vadd.f32 %v1106_v50, %v3444_v21 }
 0x4e9   :  { %v3836_v1 = vadd.f32 %v1101_v40, %v3425_v14  ;;  %v2781_v2 = vpop.f32.mrb[30].mxu0 }
 0x4ea   :  { %v1116_v28 = vadd.f32 %v2781_v2, %v2359_v59  ;;  %v1110_v3 = vpop.f32.mrb[31].mxu0 }
 0x4eb   :  { %v1111_v12 = vadd.f32 %v2359_v59, %v1110_v3  ;;  %2808 = vmatprep.mubr.msk.f32.mxu1 %vm390_vm1, %v3836_v1 }
 0x4ec   :  { %2809 = vmatmul.mubr.msk.f32.gmra.mrb[28].mxu1 %vm390_vm1, %v3839_v33  ;;  %v3849_v14 = vadd.f32 %v1116_v28, %v3478_v36 }
 0x4ed   :  { %v3846_v42 = vadd.f32 %v1111_v12, %v3460_v26  ;;  %v2784_v45 = vpop.f32.mrb[32].mxu0 }
 0x4ee   :  { %v1126_v27 = vadd.f32 %v2784_v45, %v2359_v59  ;;  %v1120_v32 = vpop.f32.mrb[33].mxu0 }
 0x4ef   :  { %v1121_v21 = vadd.f32 %v2359_v59, %v1120_v32  ;;  %2811 = vmatprep.mubr.msk.f32.mxu1 %vm390_vm1, %v3846_v42 }
 0x4f0   :  { %2812 = vmatmul.mubr.msk.f32.gmra.mrb[30].mxu1 %vm390_vm1, %v3849_v14  ;;  %v3859_v26 = vadd.f32 %v1126_v27, %v3428_v15 }
 0x4f1   :  { %v3856_v46 = vadd.f32 %v1121_v21, %v3365_v43  ;;  %v2787_v9 = vpop.f32.mrb[34].mxu0 }
 0x4f2   :  { %v1136_v49 = vadd.f32 %v2787_v9, %v2359_v59  ;;  %v1130_v22 = vpop.f32.mrb[35].mxu0 }
 0x4f3   :  { %v1131_v36 = vadd.f32 %v2359_v59, %v1130_v22  ;;  %2814 = vmatprep.mubr.msk.f32.mxu1 %vm390_vm1, %v3856_v46 }
 0x4f4   :  { %2815 = vmatmul.mubr.msk.f32.gmra.mrb[32].mxu1 %vm390_vm1, %v3859_v26  ;;  %v3869_v43 = vadd.f32 %v1136_v49, %v3456_v25 }
 0x4f5   :  { %v3866_v55 = vadd.f32 %v1131_v36, %v3437_v18  ;;  %v2790_v56 = vpop.f32.mrb[36].mxu0 }
 0x4f6   :  { %v1146_v57 = vadd.f32 %v2790_v56, %v2359_v59  ;;  %v1140_v7 = vpop.f32.mrb[37].mxu0 }
 0x4f7   :  { %v1141_v15 = vadd.f32 %v2359_v59, %v1140_v7  ;;  %2817 = vmatprep.mubr.msk.f32.mxu1 %vm390_vm1, %v3866_v55 }
 0x4f8   :  { %2818 = vmatmul.mubr.msk.f32.gmra.mrb[34].mxu1 %vm390_vm1, %v3869_v43  ;;  %v3879_v18 = vadd.f32 %v1146_v57, %v3483_v41 }
 0x4f9   :  { %v3876_v8 = vadd.f32 %v1141_v15, %v3467_v30  ;;  %v2793_v58 = vpop.f32.mrb[38].mxu0 }
 0x4fa   :  { %v1156_v62 = vadd.f32 %v2793_v58, %v2359_v59  ;;  %v1150_v13 = vpop.f32.mrb[39].mxu0 }
 0x4fb   :  { %v1151_v25 = vadd.f32 %v2359_v59, %v1150_v13  ;;  %2820 = vmatprep.mubr.msk.f32.mxu1 %vm390_vm1, %v3876_v8 }
 0x4fc   :  { %2821 = vmatmul.mubr.msk.f32.gmra.mrb[36].mxu1 %vm390_vm1, %v3879_v18  ;;  %v3889_v30 = vadd.f32 %v1156_v62, %v3508_v51  ;;  %v1412_v51 = vld [vmem:[%s4122_s10 + $0x38] sm:$0xff] }
 0x4fd   :  { %v3886_v0 = vadd.f32 %v1151_v25, %v3495_v47  ;;  %v2796_v29 = vpop.f32.mrb[40].mxu0  ;;  %v1411_v47 = vld [vmem:[%s4122_s10 + $0x30] sm:$0xff] }
 0x4fe   :  { %v1166_v17 = vadd.f32 %v2796_v29, %v2359_v59  ;;  %v1160_v19 = vpop.f32.mrb[41].mxu0  ;;  %v3041_v4 = vpack.c.bf16 %v1412_v51, %v1411_v47 }
 0x4ff   :  { %v1161_v41 = vadd.f32 %v2359_v59, %v1160_v19  ;;  %2823 = vmatprep.mubr.msk.f32.mxu1 %vm390_vm1, %v3886_v0 }
 0x500   :  { %2824 = vmatmul.mubr.msk.f32.gmra.mrb[38].mxu1 %vm390_vm1, %v3889_v30  ;;  %v3899_v54 = vadd.f32 %v1166_v17, %v3376_v53  ;;  %3042 = vmatprep.subr.bf16.mxu0 %v3041_v4  ;;  %v1630_v53 = vld [vmem:[%s4124_s12] sm:$0xff] }
 0x501   :  { %v3896_v20 = vadd.f32 %v1161_v41, %v3517_v61  ;;  %3044 = vmatpush3.bf16.msra.mxu0 %v3041_v4  ;;  %v1631_v61 = vld [vmem:[%s4124_s12 + $0x8] sm:$0xff] }
 0x502   :  { %v3045_v48 = vpack.c.bf16 %v1631_v61, %v1630_v53 }
 0x503   :  { %2826 = vmatprep.mubr.msk.f32.mxu1 %vm390_vm1, %v3896_v20 }
 0x504   :  { %2827 = vmatmul.mubr.msk.f32.gmra.mrb[40].mxu1 %vm390_vm1, %v3899_v54  ;;  %3046 = vmatprep.subr.bf16.mxu1 %v3045_v48 }
 0x505   :  { %3048 = vmatpush3.bf16.msra.mxu1 %v3045_v48 }
 0x5bb   :  { %v2807_v5 = vpop.f32.mrb[26].mxu1 }
 0x5bc   :  { %v1316_v38 = vadd.f32 %v2807_v5, %v2376_v10  ;;  %v1310_v6 = vpop.f32.mrb[27].mxu1 }
 0x5bd   :  { %v1311_v11 = vadd.f32 %v2376_v10, %v1310_v6  ;;  %v1633_v6 = vld [vmem:[%s4124_s12 + $0x18] sm:$0xff] }
 0x5be   :  { %v1390_v16 = vmax.f32 %v1316_v38, 0.0  ;;  %v1632_v38 = vld [vmem:[%s4124_s12 + $0x10] sm:$0xff] }
 0x5bf   :  { %v1389_v24 = vmax.f32 %v1311_v11, 0.0  ;;  %v2810_v35 = vpop.f32.mrb[28].mxu1  ;;  %v3049_v11 = vpack.c.bf16 %v1633_v6, %v1632_v38 }
 0x5c0   :  { %v1326_v23 = vadd.f32 %v2810_v35, %v2376_v10  ;;  %v1320_v59 = vpop.f32.mrb[29].mxu1  ;;  %v1852_v35 = vld [vmem:[%s4126_s14 + $0x10] sm:$0xff] }
 0x5c1   :  { %v1321_v60 = vadd.f32 %v2376_v10, %v1320_v59  ;;  %2845 = vmatprep.mubr.msk.f32.mxu0 %vm1420_vm3, %v1389_v24  ;;  %3050 = vmatprep.subr.bf16.mxu1 %v3049_v11  ;;  %v1851_v24 = vld [vmem:[%s4126_s14 + $0x8] sm:$0xff] }
 0x5c2   :  { %2846 = vmatmul.mubr.msk.f32.vlgmr.msra.gmra.mrb[42].mxu0 %vm1420_vm3, %v1390_v16  ;;  %v1392_v31 = vmax.f32 %v1326_v23, 0.0  ;;  %3052 = vmatpush3.bf16.msra.mxu1 %v3049_v11  ;;  %v1853_v23 = vld [vmem:[%s4126_s14 + $0x18] sm:$0xff]  ;;  %v2076_v11 = vld [vmem:[%s4128_s16 + $0x10] sm:$0xff] }
 0x5c3   :  { %v1391_v44 = vmax.f32 %v1321_v60, 0.0  ;;  %v2813_v52 = vpop.f32.mrb[30].mxu1  ;;  %v3057_v59 = vpack.c.bf16 %v1853_v23, %v1852_v35  ;;  %v1854_v60 = vld [vmem:[%s4126_s14 + $0x20] sm:$0xff]  ;;  %v2079_v23 = vld [vmem:[%s4128_s16 + $0x28] sm:$0xff] }
 0x5c4   :  { %v1336_v37 = vadd.f32 %v2813_v52, %v2376_v10  ;;  %v1330_v50 = vpop.f32.mrb[31].mxu1 }
 0x5c5   :  { %v1331_v63 = vadd.f32 %v2376_v10, %v1330_v50  ;;  %2848 = vmatprep.mubr.msk.f32.mxu0 %vm1420_vm3, %v1391_v44  ;;  %v1855_v44 = vld [vmem:[%s4126_s14 + $0x28] sm:$0xff] }
 0x5c6   :  { %2849 = vmatmul.mubr.msk.f32.gmra.mrb[44].mxu0 %vm1420_vm3, %v1392_v31  ;;  %v1394_v28 = vmax.f32 %v1336_v37, 0.0  ;;  %v3061_v52 = vpack.c.bf16 %v1855_v44, %v1854_v60  ;;  %v2393_v31 = vld [vmem:[%s4127_s11] ss:$0 sm:$0xff] }
 0x5c7   :  { %v1393_v40 = vmax.f32 %v1331_v63, 0.0  ;;  %v2816_v2 = vpop.f32.mrb[32].mxu1  ;;  %v2410_v60 = vld [vmem:[%s4129_s13] ss:$0 sm:$0xff] }
 0x5c8   :  { %v1346_v3 = vadd.f32 %v2816_v2, %v2376_v10  ;;  %v1340_v12 = vpop.f32.mrb[33].mxu1 }
 0x5c9   :  { %v1341_v45 = vadd.f32 %v2376_v10, %v1340_v12  ;;  %2851 = vmatprep.mubr.msk.f32.mxu0 %vm1420_vm3, %v1393_v40 }
 0x5ca   :  { %2852 = vmatmul.mubr.msk.f32.gmra.mrb[46].mxu0 %vm1420_vm3, %v1394_v28  ;;  %v1396_v21 = vmax.f32 %v1346_v3, 0.0 }
 0x5cb   :  { %v1395_v27 = vmax.f32 %v1341_v45, 0.0  ;;  %v2819_v32 = vpop.f32.mrb[34].mxu1 }
 0x5cc   :  { %v1356_v9 = vadd.f32 %v2819_v32, %v2376_v10  ;;  %v1350_v49 = vpop.f32.mrb[35].mxu1 }
 0x5cd   :  { %v1351_v22 = vadd.f32 %v2376_v10, %v1350_v49  ;;  %2854 = vmatprep.mubr.msk.f32.mxu0 %vm1420_vm3, %v1395_v27 }
 0x5ce   :  { %2855 = vmatmul.mubr.msk.f32.gmra.mrb[48].mxu0 %vm1420_vm3, %v1396_v21  ;;  %v1398_v57 = vmax.f32 %v1356_v9, 0.0 }
 0x5cf   :  { %v1397_v36 = vmax.f32 %v1351_v22, 0.0  ;;  %v2822_v56 = vpop.f32.mrb[36].mxu1 }
 0x5d0   :  { %v1366_v7 = vadd.f32 %v2822_v56, %v2376_v10  ;;  %v1360_v15 = vpop.f32.mrb[37].mxu1 }
 0x5d1   :  { %v1361_v58 = vadd.f32 %v2376_v10, %v1360_v15  ;;  %2857 = vmatprep.mubr.msk.f32.mxu0 %vm1420_vm3, %v1397_v36 }
 0x5d2   :  { %2858 = vmatmul.mubr.msk.f32.gmra.mrb[50].mxu0 %vm1420_vm3, %v1398_v57  ;;  %v1400_v25 = vmax.f32 %v1366_v7, 0.0 }
 0x5d3   :  { %v1399_v62 = vmax.f32 %v1361_v58, 0.0  ;;  %v2825_v13 = vpop.f32.mrb[38].mxu1 }
 0x5d4   :  { %v1376_v29 = vadd.f32 %v2825_v13, %v2376_v10  ;;  %v1370_v17 = vpop.f32.mrb[39].mxu1 }
 0x5d5   :  { %v1371_v19 = vadd.f32 %v2376_v10, %v1370_v17  ;;  %2860 = vmatprep.mubr.msk.f32.mxu0 %vm1420_vm3, %v1399_v62 }
 0x5d6   :  { %2861 = vmatmul.mubr.msk.f32.gmra.mrb[52].mxu0 %vm1420_vm3, %v1400_v25  ;;  %v1402_v51 = vmax.f32 %v1376_v29, 0.0 }
 0x5d7   :  { %v1401_v41 = vmax.f32 %v1371_v19, 0.0  ;;  %v2828_v47 = vpop.f32.mrb[40].mxu1 }
 0x5d8   :  { %v1386_v4 = vadd.f32 %v2828_v47, %v2376_v10  ;;  %v1380_v53 = vpop.f32.mrb[41].mxu1 }
 0x5d9   :  { %v1381_v61 = vadd.f32 %v2376_v10, %v1380_v53  ;;  %2863 = vmatprep.mubr.msk.f32.mxu0 %vm1420_vm3, %v1401_v41  ;;  %v1850_v10 = vld [vmem:[%s4126_s14] sm:$0xff] }
 0x5da   :  { %2864 = vmatmul.mubr.msk.f32.gmra.mrb[54].mxu0 %vm1420_vm3, %v1402_v51  ;;  %v1404_v5 = vmax.f32 %v1386_v4, 0.0  ;;  %v3053_v16 = vpack.c.bf16 %v1851_v24, %v1850_v10  ;;  %v2077_v24 = vld [vmem:[%s4128_s16 + $0x18] sm:$0xff] }
 0x5db   :  { %v1403_v48 = vmax.f32 %v1381_v61, 0.0  ;;  %v3073_v35 = vpack.c.bf16 %v2077_v24, %v2076_v11 }
 0x5dc   :  { %3054 = vmatprep.subr.bf16.mxu0 %v3053_v16 }
 0x5dd   :  { %2866 = vmatprep.mubr.msk.f32.mxu0 %vm1420_vm3, %v1403_v48  ;;  %3056 = vmatpush3.bf16.msra.mxu0 %v3053_v16  ;;  %v2078_v16 = vld [vmem:[%s4128_s16 + $0x20] sm:$0xff] }
 0x5de   :  { %2867 = vmatmul.mubr.msk.f32.gmra.mrb[56].mxu0 %vm1420_vm3, %v1404_v5  ;;  %3058 = vmatprep.subr.bf16.mxu0 %v3057_v59 }
 0x5e1   :  { %3060 = vmatpush3.bf16.msra.mxu0 %v3057_v59  ;;  %v3077_v59 = vpack.c.bf16 %v2079_v23, %v2078_v16 }
 0x5e2   :  { %3062 = vmatprep.subr.bf16.mxu0 %v3061_v52 }
 0x5e5   :  { %3064 = vmatpush3.bf16.msra.mxu0 %v3061_v52 }
 0x695   :  { %v2847_v37 = vpop.f32.mrb[42].mxu0 }
 0x696   :  { %v1541_v50 = vadd.f32 %v2847_v37, %v2393_v31  ;;  %v1535_v63 = vpop.f32.mrb[43].mxu0 }
 0x697   :  { %v1536_v40 = vadd.f32 %v2393_v31, %v1535_v63 }
 0x698   :  { %v1615_v3 = vadd.f32 %v1541_v50, %v3829_v39 }
 0x699   :  { %v1614_v2 = vadd.f32 %v1536_v40, %v3826_v34  ;;  %v2850_v28 = vpop.f32.mrb[44].mxu0 }
 0x69a   :  { %v1551_v12 = vadd.f32 %v2850_v28, %v2393_v31  ;;  %v1545_v45 = vpop.f32.mrb[45].mxu0 }
 0x69b   :  { %v1546_v27 = vadd.f32 %v2393_v31, %v1545_v45  ;;  %2877 = vmatprep.mubr.msk.f32.mxu1 %vm390_vm1, %v1614_v2 }
 0x69c   :  { %2878 = vmatmul.mubr.msk.f32.vlgmr.msra.gmra.mrb[42].mxu1 %vm390_vm1, %v1615_v3  ;;  %v1617_v9 = vadd.f32 %v1551_v12, %v3839_v33 }
 0x69d   :  { %v1616_v32 = vadd.f32 %v1546_v27, %v3836_v1  ;;  %v2853_v21 = vpop.f32.mrb[46].mxu0 }
 0x69e   :  { %v1561_v49 = vadd.f32 %v2853_v21, %v2393_v31  ;;  %v1555_v22 = vpop.f32.mrb[47].mxu0 }
 0x69f   :  { %v1556_v36 = vadd.f32 %v2393_v31, %v1555_v22  ;;  %2880 = vmatprep.mubr.msk.f32.mxu1 %vm390_vm1, %v1616_v32 }
 0x6a0   :  { %2881 = vmatmul.mubr.msk.f32.gmra.mrb[44].mxu1 %vm390_vm1, %v1617_v9  ;;  %v1619_v56 = vadd.f32 %v1561_v49, %v3849_v14 }
 0x6a1   :  { %v1618_v34 = vadd.f32 %v1556_v36, %v3846_v42  ;;  %v2856_v39 = vpop.f32.mrb[48].mxu0 }
 0x6a2   :  { %v1571_v57 = vadd.f32 %v2856_v39, %v2393_v31  ;;  %v1565_v7 = vpop.f32.mrb[49].mxu0 }
 0x6a3   :  { %v1566_v15 = vadd.f32 %v2393_v31, %v1565_v7  ;;  %2883 = vmatprep.mubr.msk.f32.mxu1 %vm390_vm1, %v1618_v34 }
 0x6a4   :  { %2884 = vmatmul.mubr.msk.f32.gmra.mrb[46].mxu1 %vm390_vm1, %v1619_v56  ;;  %v1621_v58 = vadd.f32 %v1571_v57, %v3859_v26 }
 0x6a5   :  { %v1620_v1 = vadd.f32 %v1566_v15, %v3856_v46  ;;  %v2859_v33 = vpop.f32.mrb[50].mxu0 }
 0x6a6   :  { %v1581_v62 = vadd.f32 %v2859_v33, %v2393_v31  ;;  %v1575_v13 = vpop.f32.mrb[51].mxu0 }
 0x6a7   :  { %v1576_v25 = vadd.f32 %v2393_v31, %v1575_v13  ;;  %2886 = vmatprep.mubr.msk.f32.mxu1 %vm390_vm1, %v1620_v1 }
 0x6a8   :  { %2887 = vmatmul.mubr.msk.f32.gmra.mrb[48].mxu1 %vm390_vm1, %v1621_v58  ;;  %v1623_v29 = vadd.f32 %v1581_v62, %v3869_v43 }
 0x6a9   :  { %v1622_v42 = vadd.f32 %v1576_v25, %v3866_v55  ;;  %v2862_v14 = vpop.f32.mrb[52].mxu0 }
 0x6aa   :  { %v1591_v17 = vadd.f32 %v2862_v14, %v2393_v31  ;;  %v1585_v19 = vpop.f32.mrb[53].mxu0 }
 0x6ab   :  { %v1586_v41 = vadd.f32 %v2393_v31, %v1585_v19  ;;  %2889 = vmatprep.mubr.msk.f32.mxu1 %vm390_vm1, %v1622_v42 }
 0x6ac   :  { %2890 = vmatmul.mubr.msk.f32.gmra.mrb[50].mxu1 %vm390_vm1, %v1623_v29  ;;  %v1625_v47 = vadd.f32 %v1591_v17, %v3879_v18 }
 0x6ad   :  { %v1624_v46 = vadd.f32 %v1586_v41, %v3876_v8  ;;  %v2865_v26 = vpop.f32.mrb[54].mxu0 }
 0x6ae   :  { %v1601_v51 = vadd.f32 %v2865_v26, %v2393_v31  ;;  %v1595_v4 = vpop.f32.mrb[55].mxu0 }
 0x6af   :  { %v1596_v53 = vadd.f32 %v2393_v31, %v1595_v4  ;;  %2892 = vmatprep.mubr.msk.f32.mxu1 %vm390_vm1, %v1624_v46 }
 0x6b0   :  { %2893 = vmatmul.mubr.msk.f32.gmra.mrb[52].mxu1 %vm390_vm1, %v1625_v47  ;;  %v1627_v61 = vadd.f32 %v1601_v51, %v3889_v30  ;;  %v1857_v30 = vld [vmem:[%s4126_s14 + $0x38] sm:$0xff] }
 0x6b1   :  { %v1626_v55 = vadd.f32 %v1596_v53, %v3886_v0  ;;  %v2868_v43 = vpop.f32.mrb[56].mxu0  ;;  %v1856_v0 = vld [vmem:[%s4126_s14 + $0x30] sm:$0xff] }
 0x6b2   :  { %v1611_v48 = vadd.f32 %v2868_v43, %v2393_v31  ;;  %v1605_v5 = vpop.f32.mrb[57].mxu0  ;;  %v3065_v6 = vpack.c.bf16 %v1857_v30, %v1856_v0  ;;  %v2427_v0 = vld [vmem:[%s4130_s15] ss:$0 sm:$0xff] }
 0x6b3   :  { %v1606_v38 = vadd.f32 %v2393_v31, %v1605_v5  ;;  %2895 = vmatprep.mubr.msk.f32.mxu1 %vm390_vm1, %v1626_v55 }
 0x6b4   :  { %2896 = vmatmul.mubr.msk.f32.gmra.mrb[54].mxu1 %vm390_vm1, %v1627_v61  ;;  %v1629_v18 = vadd.f32 %v1611_v48, %v3899_v54  ;;  %3066 = vmatprep.subr.bf16.mxu0 %v3065_v6  ;;  %v2075_v54 = vld [vmem:[%s4128_s16 + $0x8] sm:$0xff] }
 0x6b5   :  { %v1628_v8 = vadd.f32 %v1606_v38, %v3896_v20  ;;  %3068 = vmatpush3.bf16.msra.mxu0 %v3065_v6  ;;  %v2074_v20 = vld [vmem:[%s4128_s16] sm:$0xff]  ;;  %v2080_v38 = vld [vmem:[%s4128_s16 + $0x30] sm:$0xff] }
 0x6b6   :  { %v3069_v10 = vpack.c.bf16 %v2075_v54, %v2074_v20 }
 0x6b7   :  { %2898 = vmatprep.mubr.msk.f32.mxu1 %vm390_vm1, %v1628_v8  ;;  %v2081_v8 = vld [vmem:[%s4128_s16 + $0x38] sm:$0xff] }
 0x6b8   :  { %2899 = vmatmul.mubr.msk.f32.gmra.mrb[56].mxu1 %vm390_vm1, %v1629_v18  ;;  %3070 = vmatprep.subr.bf16.mxu1 %v3069_v10  ;;  %v3081_v18 = vpack.c.bf16 %v2081_v8, %v2080_v38 }
 0x6b9   :  { %3072 = vmatpush3.bf16.msra.mxu1 %v3069_v10 }
 0x6ba   :  { %3074 = vmatprep.subr.bf16.mxu1 %v3073_v35 }
 0x6bd   :  { %3076 = vmatpush3.bf16.msra.mxu1 %v3073_v35 }
 0x6be   :  { %3078 = vmatprep.subr.bf16.mxu1 %v3077_v59 }
 0x6c1   :  { %3080 = vmatpush3.bf16.msra.mxu1 %v3077_v59 }
 0x6c2   :  { %3082 = vmatprep.subr.bf16.mxu1 %v3081_v18 }
 0x6c5   :  { %3084 = vmatpush3.bf16.msra.mxu1 %v3081_v18 }
 0x76f   :  { %v2879_v44 = vpop.f32.mrb[42].mxu1 }
 0x770   :  { %v1761_v52 = vadd.f32 %v2879_v44, %v2410_v60  ;;  %v1755_v31 = vpop.f32.mrb[43].mxu1 }
 0x771   :  { %v1756_v37 = vadd.f32 %v2410_v60, %v1755_v31 }
 0x772   :  { %v1835_v40 = vmax.f32 %v1761_v52, 0.0 }
 0x773   :  { %v1834_v50 = vmax.f32 %v1756_v37, 0.0  ;;  %v2882_v63 = vpop.f32.mrb[44].mxu1 }
 0x774   :  { %v1771_v2 = vadd.f32 %v2882_v63, %v2410_v60  ;;  %v1765_v28 = vpop.f32.mrb[45].mxu1 }
 0x775   :  { %v1766_v3 = vadd.f32 %v2410_v60, %v1765_v28  ;;  %2917 = vmatprep.mubr.msk.f32.mxu0 %vm1420_vm3, %v1834_v50 }
 0x776   :  { %2918 = vmatmul.mubr.msk.f32.vlgmr.msra.gmra.mrb[58].mxu0 %vm1420_vm3, %v1835_v40  ;;  %v1837_v27 = vmax.f32 %v1771_v2, 0.0 }
 0x777   :  { %v1836_v12 = vmax.f32 %v1766_v3, 0.0  ;;  %v2885_v45 = vpop.f32.mrb[46].mxu1 }
 0x778   :  { %v1781_v32 = vadd.f32 %v2885_v45, %v2410_v60  ;;  %v1775_v21 = vpop.f32.mrb[47].mxu1 }
 0x779   :  { %v1776_v9 = vadd.f32 %v2410_v60, %v1775_v21  ;;  %2920 = vmatprep.mubr.msk.f32.mxu0 %vm1420_vm3, %v1836_v12 }
 0x77a   :  { %2921 = vmatmul.mubr.msk.f32.gmra.mrb[60].mxu0 %vm1420_vm3, %v1837_v27  ;;  %v1839_v36 = vmax.f32 %v1781_v32, 0.0 }
 0x77b   :  { %v1838_v49 = vmax.f32 %v1776_v9, 0.0  ;;  %v2888_v22 = vpop.f32.mrb[48].mxu1 }
 0x77c   :  { %v1791_v34 = vadd.f32 %v2888_v22, %v2410_v60  ;;  %v1785_v39 = vpop.f32.mrb[49].mxu1 }
 0x77d   :  { %v1786_v56 = vadd.f32 %v2410_v60, %v1785_v39  ;;  %2923 = vmatprep.mubr.msk.f32.mxu0 %vm1420_vm3, %v1838_v49 }
 0x77e   :  { %2924 = vmatmul.mubr.msk.f32.gmra.mrb[62].mxu0 %vm1420_vm3, %v1839_v36  ;;  %v1841_v15 = vmax.f32 %v1791_v34, 0.0 }
 0x77f   :  { %v1840_v57 = vmax.f32 %v1786_v56, 0.0  ;;  %v2891_v7 = vpop.f32.mrb[50].mxu1 }
 0x780   :  { %v1801_v1 = vadd.f32 %v2891_v7, %v2410_v60  ;;  %v1795_v33 = vpop.f32.mrb[51].mxu1 }
 0x781   :  { %v1796_v58 = vadd.f32 %v2410_v60, %v1795_v33  ;;  %2926 = vmatprep.mubr.msk.f32.mxu0 %vm1420_vm3, %v1840_v57 }
 0x782   :  { %2927 = vmatmul.mubr.msk.f32.gmra.mrb[64].mxu0 %vm1420_vm3, %v1841_v15  ;;  %v1843_v25 = vmax.f32 %v1801_v1, 0.0 }
 0x783   :  { %v1842_v62 = vmax.f32 %v1796_v58, 0.0  ;;  %v2894_v13 = vpop.f32.mrb[52].mxu1 }
 0x784   :  { %v1811_v42 = vadd.f32 %v2894_v13, %v2410_v60  ;;  %v1805_v14 = vpop.f32.mrb[53].mxu1 }
 0x785   :  { %v1806_v29 = vadd.f32 %v2410_v60, %v1805_v14  ;;  %2929 = vmatprep.mubr.msk.f32.mxu0 %vm1420_vm3, %v1842_v62 }
 0x786   :  { %2930 = vmatmul.mubr.msk.f32.gmra.mrb[66].mxu0 %vm1420_vm3, %v1843_v25  ;;  %v1845_v41 = vmax.f32 %v1811_v42, 0.0 }
 0x787   :  { %v1844_v17 = vmax.f32 %v1806_v29, 0.0  ;;  %v2897_v19 = vpop.f32.mrb[54].mxu1 }
 0x788   :  { %v1821_v46 = vadd.f32 %v2897_v19, %v2410_v60  ;;  %v1815_v26 = vpop.f32.mrb[55].mxu1 }
 0x789   :  { %v1816_v47 = vadd.f32 %v2410_v60, %v1815_v26  ;;  %2932 = vmatprep.mubr.msk.f32.mxu0 %vm1420_vm3, %v1844_v17 }
 0x78a   :  { %2933 = vmatmul.mubr.msk.f32.gmra.mrb[68].mxu0 %vm1420_vm3, %v1845_v41  ;;  %v1847_v53 = vmax.f32 %v1821_v46, 0.0  ;;  %v2444_v41 = vld [vmem:[%s4131_s17] ss:$0 sm:$0xff] }
 0x78b   :  { %v1846_v51 = vmax.f32 %v1816_v47, 0.0  ;;  %v2900_v4 = vpop.f32.mrb[56].mxu1 }
 0x78c   :  { %v1831_v55 = vadd.f32 %v2900_v4, %v2410_v60  ;;  %v1825_v43 = vpop.f32.mrb[57].mxu1 }
 0x78d   :  { %v1826_v61 = vadd.f32 %v2410_v60, %v1825_v43  ;;  %2935 = vmatprep.mubr.msk.f32.mxu0 %vm1420_vm3, %v1846_v51 }
 0x78e   :  { %2936 = vmatmul.mubr.msk.f32.gmra.mrb[70].mxu0 %vm1420_vm3, %v1847_v53  ;;  %v1849_v5 = vmax.f32 %v1831_v55, 0.0 }
 0x78f   :  { %v1848_v48 = vmax.f32 %v1826_v61, 0.0 }
 0x791   :  { %2938 = vmatprep.mubr.msk.f32.mxu0 %vm1420_vm3, %v1848_v48 }
 0x792   :  { %2939 = vmatmul.mubr.msk.f32.gmra.mrb[72].mxu0 %vm1420_vm3, %v1849_v5 }
 0x849   :  { %v2919_v30 = vpop.f32.mrb[58].mxu0 }
 0x84a   :  { %v1985_v6 = vadd.f32 %v2919_v30, %v2427_v0  ;;  %v1979_v20 = vpop.f32.mrb[59].mxu0 }
 0x84b   :  { %v1980_v54 = vadd.f32 %v2427_v0, %v1979_v20 }
 0x84c   :  { %v2059_v24 = vmax.f32 %v1985_v6, 0.0 }
 0x84d   :  { %v2058_v11 = vmax.f32 %v1980_v54, 0.0  ;;  %v2922_v10 = vpop.f32.mrb[60].mxu0 }
 0x84e   :  { %v1995_v35 = vadd.f32 %v2922_v10, %v2427_v0  ;;  %v1989_v16 = vpop.f32.mrb[61].mxu0 }
 0x84f   :  { %v1990_v23 = vadd.f32 %v2427_v0, %v1989_v16  ;;  %2957 = vmatprep.mubr.msk.f32.mxu1 %vm1420_vm3, %v2058_v11 }
 0x850   :  { %2958 = vmatmul.mubr.msk.f32.vlgmr.msra.gmra.mrb[58].mxu1 %vm1420_vm3, %v2059_v24  ;;  %v2061_v44 = vmax.f32 %v1995_v35, 0.0 }
 0x851   :  { %v2060_v59 = vmax.f32 %v1990_v23, 0.0  ;;  %v2925_v60 = vpop.f32.mrb[62].mxu0 }
 0x852   :  { %v2005_v52 = vadd.f32 %v2925_v60, %v2427_v0  ;;  %v1999_v31 = vpop.f32.mrb[63].mxu0 }
 0x853   :  { %v2000_v37 = vadd.f32 %v2427_v0, %v1999_v31  ;;  %2960 = vmatprep.mubr.msk.f32.mxu1 %vm1420_vm3, %v2060_v59 }
 0x854   :  { %2961 = vmatmul.mubr.msk.f32.gmra.mrb[60].mxu1 %vm1420_vm3, %v2061_v44  ;;  %v2063_v40 = vmax.f32 %v2005_v52, 0.0 }
 0x855   :  { %v2062_v50 = vmax.f32 %v2000_v37, 0.0  ;;  %v2928_v63 = vpop.f32.mrb[64].mxu0 }
 0x856   :  { %v2015_v2 = vadd.f32 %v2928_v63, %v2427_v0  ;;  %v2009_v28 = vpop.f32.mrb[65].mxu0 }
 0x857   :  { %v2010_v3 = vadd.f32 %v2427_v0, %v2009_v28  ;;  %2963 = vmatprep.mubr.msk.f32.mxu1 %vm1420_vm3, %v2062_v50 }
 0x858   :  { %2964 = vmatmul.mubr.msk.f32.gmra.mrb[62].mxu1 %vm1420_vm3, %v2063_v40  ;;  %v2065_v27 = vmax.f32 %v2015_v2, 0.0 }
 0x859   :  { %v2064_v12 = vmax.f32 %v2010_v3, 0.0  ;;  %v2931_v45 = vpop.f32.mrb[66].mxu0 }
 0x85a   :  { %v2025_v32 = vadd.f32 %v2931_v45, %v2427_v0  ;;  %v2019_v21 = vpop.f32.mrb[67].mxu0 }
 0x85b   :  { %v2020_v9 = vadd.f32 %v2427_v0, %v2019_v21  ;;  %2966 = vmatprep.mubr.msk.f32.mxu1 %vm1420_vm3, %v2064_v12 }
 0x85c   :  { %2967 = vmatmul.mubr.msk.f32.gmra.mrb[64].mxu1 %vm1420_vm3, %v2065_v27  ;;  %v2067_v36 = vmax.f32 %v2025_v32, 0.0 }
 0x85d   :  { %v2066_v49 = vmax.f32 %v2020_v9, 0.0  ;;  %v2934_v22 = vpop.f32.mrb[68].mxu0 }
 0x85e   :  { %v2035_v34 = vadd.f32 %v2934_v22, %v2427_v0  ;;  %v2029_v39 = vpop.f32.mrb[69].mxu0 }
 0x85f   :  { %v2030_v56 = vadd.f32 %v2427_v0, %v2029_v39  ;;  %2969 = vmatprep.mubr.msk.f32.mxu1 %vm1420_vm3, %v2066_v49 }
 0x860   :  { %2970 = vmatmul.mubr.msk.f32.gmra.mrb[66].mxu1 %vm1420_vm3, %v2067_v36  ;;  %v2069_v15 = vmax.f32 %v2035_v34, 0.0 }
 0x861   :  { %v2068_v57 = vmax.f32 %v2030_v56, 0.0  ;;  %v2937_v7 = vpop.f32.mrb[70].mxu0 }
 0x862   :  { %v2045_v1 = vadd.f32 %v2937_v7, %v2427_v0  ;;  %v2039_v33 = vpop.f32.mrb[71].mxu0 }
 0x863   :  { %v2040_v58 = vadd.f32 %v2427_v0, %v2039_v33  ;;  %2972 = vmatprep.mubr.msk.f32.mxu1 %vm1420_vm3, %v2068_v57 }
 0x864   :  { %2973 = vmatmul.mubr.msk.f32.gmra.mrb[68].mxu1 %vm1420_vm3, %v2069_v15  ;;  %v2071_v25 = vmax.f32 %v2045_v1, 0.0 }
 0x865   :  { %v2070_v62 = vmax.f32 %v2040_v58, 0.0  ;;  %v2940_v13 = vpop.f32.mrb[72].mxu0 }
 0x866   :  { %v2055_v42 = vadd.f32 %v2940_v13, %v2427_v0  ;;  %v2049_v14 = vpop.f32.mrb[73].mxu0 }
 0x867   :  { %v2050_v29 = vadd.f32 %v2427_v0, %v2049_v14  ;;  %2975 = vmatprep.mubr.msk.f32.mxu1 %vm1420_vm3, %v2070_v62 }
 0x868   :  { %2976 = vmatmul.mubr.msk.f32.gmra.mrb[70].mxu1 %vm1420_vm3, %v2071_v25  ;;  %v2073_v19 = vmax.f32 %v2055_v42, 0.0 }
 0x869   :  { %v2072_v17 = vmax.f32 %v2050_v29, 0.0 }
 0x86b   :  { %2978 = vmatprep.mubr.msk.f32.mxu1 %vm1420_vm3, %v2072_v17 }
 0x86c   :  { %2979 = vmatmul.mubr.msk.f32.gmra.mrb[72].mxu1 %vm1420_vm3, %v2073_v19 }
 0x923   :  { %v2959_v46 = vpop.f32.mrb[58].mxu1 }
 0x924   :  { %v2209_v26 = vadd.f32 %v2959_v46, %v2444_v41  ;;  %v2203_v47 = vpop.f32.mrb[59].mxu1 }
 0x925   :  { %v2204_v51 = vadd.f32 %v2444_v41, %v2203_v47 }
 0x926   :  { %2283 = vst [vmem:[%s4132_s18 + $0x8] sm:$0xff] %v2209_v26 }
 0x927   :  { %2282 = vst [vmem:[%s4132_s18] sm:$0xff] %v2204_v51  ;;  %v2962_v4 = vpop.f32.mrb[60].mxu1 }
 0x928   :  { %v2219_v53 = vadd.f32 %v2962_v4, %v2444_v41  ;;  %v2213_v55 = vpop.f32.mrb[61].mxu1 }
 0x929   :  { %v2214_v43 = vadd.f32 %v2444_v41, %v2213_v55 }
 0x92a   :  { %2285 = vst [vmem:[%s4132_s18 + $0x18] sm:$0xff] %v2219_v53 }
 0x92b   :  { %2284 = vst [vmem:[%s4132_s18 + $0x10] sm:$0xff] %v2214_v43  ;;  %v2965_v61 = vpop.f32.mrb[62].mxu1 }
 0x92c   :  { %v2229_v48 = vadd.f32 %v2965_v61, %v2444_v41  ;;  %v2223_v5 = vpop.f32.mrb[63].mxu1 }
 0x92d   :  { %v2224_v38 = vadd.f32 %v2444_v41, %v2223_v5 }
 0x92e   :  { %2287 = vst [vmem:[%s4132_s18 + $0x28] sm:$0xff] %v2229_v48 }
 0x92f   :  { %2286 = vst [vmem:[%s4132_s18 + $0x20] sm:$0xff] %v2224_v38  ;;  %v2968_v8 = vpop.f32.mrb[64].mxu1 }
 0x930   :  { %v2239_v18 = vadd.f32 %v2968_v8, %v2444_v41  ;;  %v2233_v0 = vpop.f32.mrb[65].mxu1 }
 0x931   :  { %v2234_v30 = vadd.f32 %v2444_v41, %v2233_v0 }
 0x932   :  { %2289 = vst [vmem:[%s4132_s18 + $0x38] sm:$0xff] %v2239_v18 }
 0x933   :  { %2288 = vst [vmem:[%s4132_s18 + $0x30] sm:$0xff] %v2234_v30  ;;  %v2971_v6 = vpop.f32.mrb[66].mxu1 }
 0x934   :  { %v2249_v20 = vadd.f32 %v2971_v6, %v2444_v41  ;;  %v2243_v54 = vpop.f32.mrb[67].mxu1 }
 0x935   :  { %v2244_v11 = vadd.f32 %v2444_v41, %v2243_v54 }
 0x936   :  { %2291 = vst [vmem:[%s4132_s18 + $0x48] sm:$0xff] %v2249_v20 }
 0x937   :  { %2290 = vst [vmem:[%s4132_s18 + $0x40] sm:$0xff] %v2244_v11  ;;  %v2974_v10 = vpop.f32.mrb[68].mxu1 }
 0x938   :  { %v2259_v24 = vadd.f32 %v2974_v10, %v2444_v41  ;;  %v2253_v35 = vpop.f32.mrb[69].mxu1 }
 0x939   :  { %v2254_v16 = vadd.f32 %v2444_v41, %v2253_v35 }
 0x93a   :  { %2293 = vst [vmem:[%s4132_s18 + $0x58] sm:$0xff] %v2259_v24 }
 0x93b   :  { %2292 = vst [vmem:[%s4132_s18 + $0x50] sm:$0xff] %v2254_v16  ;;  %v2977_v23 = vpop.f32.mrb[70].mxu1 }
 0x93c   :  { %v2269_v59 = vadd.f32 %v2977_v23, %v2444_v41  ;;  %v2263_v60 = vpop.f32.mrb[71].mxu1 }
 0x93d   :  { %v2264_v44 = vadd.f32 %v2444_v41, %v2263_v60 }
 0x93e   :  { %2295 = vst [vmem:[%s4132_s18 + $0x68] sm:$0xff] %v2269_v59 }
 0x93f   :  { %2294 = vst [vmem:[%s4132_s18 + $0x60] sm:$0xff] %v2264_v44  ;;  %v2980_v52 = vpop.f32.mrb[72].mxu1 }
 0x940   :  { %v2279_v31 = vadd.f32 %v2980_v52, %v2444_v41  ;;  %v2273_v37 = vpop.f32.mrb[73].mxu1 }
 0x941   :  { %v2274_v50 = vadd.f32 %v2444_v41, %v2273_v37 }
 0x942   :  { %2297 = vst [vmem:[%s4132_s18 + $0x78] sm:$0xff] %v2279_v31 }
 0x943   :  { %2296 = vst [vmem:[%s4132_s18 + $0x70] sm:$0xff] %v2274_v50 }

</bundles_post_ra>
